<compile_context>
chip_gen: v7x
topology: tpu7x:2x2x1
jax: 0.10.0
libtpu: 0.0.40
codegen_flags: <defaults>
</compile_context>

<pallas_src>
import functools

import jax
import jax.numpy as jnp
from jax.experimental import pallas as pl
from jax.experimental.pallas import tpu as pltpu

LANE = 128
SUBLANE = 8
NUM_CLASSES = 40                 # fixed by the module: nn.Linear(output_size, 40)
HALF_SPECTRUM_HI = 440 // 2 + 1  # FFT slice [1 : 221]


def _round_up(x, m):
    return ((x + m - 1) // m) * m


def freq_encoder_kernel(x_ref, dft_ref, wih_ref, whh_ref, blstm_ref,
                        wout_ref, bout_ref, wcls_ref, bcls_ref,
                        logits_ref, xa_ref, *, seq_len, hid_pad):
    """One batch tile: batched DFT amplitude + input projection (big MXU
    matmuls), then a tiny serial LSTM recurrence and two fused output linears."""
    tb = x_ref.shape[1]
    bt = tb // seq_len
    k_pad = dft_ref.shape[1] // 2

    # (T*bt, N_pad) slab; leading-axis squeeze of the size-1 tile dim is free.
    x_all = x_ref[0]

    # --- one streaming MXU matmul for the whole tile: combined [cos | -sin] DFT ---
    ri = jnp.dot(x_all, dft_ref[...], preferred_element_type=jnp.float32)  # (T*bt, 2*k_pad)
    re = ri[:, :k_pad]                   # split at a 128-aligned lane boundary: free
    im = ri[:, k_pad:]
    amp = jnp.sqrt(re * re + im * im)    # |X[k]|; padded lanes stay exactly 0

    # --- batched input projection with the LSTM bias folded in (no per-step
    # broadcast_in_dim inside the recurrence) ---
    x_proj = (jnp.dot(amp, wih_ref[...], preferred_element_type=jnp.float32)
              + blstm_ref[...])                                # (T*bt, 4*hid_pad)
    x_proj = x_proj.reshape(seq_len, bt, 4 * hid_pad)          # f32, bt % 8 == 0: layout-preserving

    w_hh = whh_ref[...]
    h = jnp.zeros((bt, hid_pad), jnp.float32)
    c = jnp.zeros((bt, hid_pad), jnp.float32)

    # Serial part is now only h @ W_hh + lane-dense gate elementwise.
    # seq_len is small and static -> fully unrolled for LLO visibility.
    # TODO(synk): for seq_len >~ 16 switch to lax.fori_loop over a VMEM-resident
    # x_proj scratch to bound vreg live ranges.
    for t in range(seq_len):
        gates = x_proj[t] + jnp.dot(h, w_hh, preferred_element_type=jnp.float32)
        i_g = jax.nn.sigmoid(gates[:, 0 * hid_pad:1 * hid_pad])   # 128-lane gate blocks:
        f_g = jax.nn.sigmoid(gates[:, 1 * hid_pad:2 * hid_pad])   # free vreg splits
        g_g = jnp.tanh(gates[:, 2 * hid_pad:3 * hid_pad])
        o_g = jax.nn.sigmoid(gates[:, 3 * hid_pad:4 * hid_pad])
        c = f_g * c + i_g * g_g
        h = o_g * jnp.tanh(c)

    # xa = relu(h @ W_out + b_out); padded output lanes stay exactly 0.
    xa = jnp.maximum(
        jnp.dot(h, wout_ref[...], preferred_element_type=jnp.float32) + bout_ref[...],
        0.0)                                                     # (bt, out_pad)
    logits = (jnp.dot(xa, wcls_ref[...], preferred_element_type=jnp.float32)
              + bcls_ref[...])                                   # (bt, cls_pad)

    xa_ref[...] = xa.astype(xa_ref.dtype)
    logits_ref[...] = logits.astype(logits_ref.dtype)


def freq_encoder_forward(x, params, *, batch_tile=256, mxu_dtype=jnp.bfloat16):
    """x: (B, T, N) float32 raw signal.  Returns (logits (B, 40), xa (B, output_size))."""
    B, T, N = x.shape
    w_ih, w_hh, b_lstm = params["lstm"]        # (K, 4H), (H, 4H), (1, 4H)
    w_out, b_out = params["output"]            # (H, OUT), (1, OUT)
    w_cls, b_cls = params["classifier"]        # (OUT, 40), (1, 40)

    K = w_ih.shape[0]
    H = w_hh.shape[0]
    OUT = w_out.shape[1]
    assert K == min(HALF_SPECTRUM_HI - 1, N - 1), "LSTM input_size must match half-spectrum"

    # --- lane-pad every narrow feature dim ---
    n_pad = _round_up(N, LANE)                 # DFT contraction dim
    k_pad = _round_up(K, LANE)                 # half-spectrum bins
    hid_pad = _round_up(H, LANE)               # each gate gets its own 128-lane block
    out_pad = _round_up(OUT, LANE)
    cls_pad = _round_up(NUM_CLASSES, LANE)

    # Combined DFT matrix [cos | -sin] for bins 1..K.  Pad rows/cols are zero,
    # so padded x columns contribute nothing and padded amp lanes stay 0.
    jj = jnp.arange(N, dtype=jnp.float32)[:, None]
    kk = jnp.arange(1, K + 1, dtype=jnp.float32)[None, :]
    ang = 2.0 * jnp.pi * jj * kk / float(N)
    cos_m = jnp.pad(jnp.cos(ang), ((0, n_pad - N), (0, k_pad - K)))
    sin_m = jnp.pad(-jnp.sin(ang), ((0, n_pad - N), (0, k_pad - K)))
    dft = jnp.concatenate([cos_m, sin_m], axis=1).astype(mxu_dtype)   # (n_pad, 2*k_pad)

    def pad_gates(w, rows_pad):
        """(R, 4H) -> (rows_pad, 4*hid_pad) with each gate in its own lane block."""
        r = w.shape[0]
        blocks = []
        for g in range(4):
            blk = jnp.zeros((rows_pad, hid_pad), jnp.float32)
            blk = blk.at[:r, :H].set(w[:, g * H:(g + 1) * H])
            blocks.append(blk)
        return jnp.concatenate(blocks, axis=1)

    w_ih_p = pad_gates(w_ih, k_pad)            # (k_pad, 4*hid_pad)
    w_hh_p = pad_gates(w_hh, hid_pad)          # (hid_pad, 4*hid_pad)
    b_lstm_p = pad_gates(b_lstm, 1)            # (1, 4*hid_pad)
    w_out_p = jnp.pad(w_out, ((0, hid_pad - H), (0, out_pad - OUT)))
    b_out_p = jnp.pad(b_out, ((0, 0), (0, out_pad - OUT)))
    w_cls_p = jnp.pad(w_cls, ((0, out_pad - OUT), (0, cls_pad - NUM_CLASSES)))
    b_cls_p = jnp.pad(b_cls, ((0, 0), (0, cls_pad - NUM_CLASSES)))

    # --- batch tiling: cap the tile at ceil(B/2) so the grid has >= 2 steps
    # (second TensorCore on v7x is not left idle); pad the remainder. ---
    half_batch = (_round_up(B, SUBLANE) + 1) // 2
    bt = _round_up(min(batch_tile, max(half_batch, SUBLANE)), SUBLANE)
    b_pad = _round_up(B, bt)
    num_tiles = b_pad // bt
    grid = (num_tiles,)

    # Re-tile x in the wrapper (layout plumbing, not compute): each grid step
    # gets one dense (T*bt, n_pad) slab, so there is zero per-timestep slicing
    # or relayout inside the kernel.  Storing in mxu_dtype (bf16 by default)
    # halves HBM traffic for the dominant x DMA.
    x_t = jnp.swapaxes(x.astype(jnp.float32), 0, 1)                    # (T, B, N)
    x_t = jnp.pad(x_t, ((0, 0), (0, b_pad - B), (0, n_pad - N)))
    x_tiles = (x_t.reshape(T, num_tiles, bt, n_pad)
               .transpose(1, 0, 2, 3)
               .reshape(num_tiles, T * bt, n_pad)
               .astype(mxu_dtype))

    def const_spec(arr):
        # Whole-array block with a constant index_map: grid-invariant weights.
        nd = arr.ndim
        return pl.BlockSpec(arr.shape, lambda i, _nd=nd: (0,) * _nd)

    weights = (dft, w_ih_p, w_hh_p, b_lstm_p, w_out_p, b_out_p, w_cls_p, b_cls_p)
    in_specs = [pl.BlockSpec((1, T * bt, n_pad), lambda i: (i, 0, 0))]
    in_specs += [const_spec(w) for w in weights]
    out_specs = [
        pl.BlockSpec((bt, cls_pad), lambda i: (i, 0)),   # lane-dense (128) outputs
        pl.BlockSpec((bt, out_pad), lambda i: (i, 0)),
    ]
    out_shape = (
        jax.ShapeDtypeStruct((b_pad, cls_pad), jnp.float32),
        jax.ShapeDtypeStruct((b_pad, out_pad), jnp.float32),
    )

    # Explicit VMEM budget: v5e default scoped VMEM is 16 MiB, v7x physical is
    # 64 MiB — compute from the actual tile sizes instead of relying on defaults.
    f32b = 4
    mxu_b = jnp.dtype(mxu_dtype).itemsize
    x_block_bytes = T * bt * n_pad * mxu_b
    weight_bytes = int(dft.size) * mxu_b + sum(int(w.size) for w in weights[1:]) * f32b
    interm_bytes = T * bt * (3 * k_pad + 4 * hid_pad) * f32b + 16 * bt * hid_pad * f32b
    out_bytes = bt * (cls_pad + out_pad) * f32b
    vmem_est = (2 * x_block_bytes + 2 * weight_bytes + interm_bytes
                + 2 * out_bytes + (8 << 20))
    vmem_limit = int(min(max(vmem_est, 32 << 20), 64 << 20))

    gate_cols = 4 * hid_pad
    flops = b_pad * (
        T * (2 * n_pad * 2 * k_pad + 2 * k_pad * gate_cols + 2 * hid_pad * gate_cols)
        + 2 * hid_pad * out_pad + 2 * out_pad * cls_pad)
    transcendentals = b_pad * T * (k_pad + 5 * hid_pad)   # sqrt + 3*sigmoid + 2*tanh
    bytes_accessed = (int(x_tiles.size) * mxu_b + weight_bytes
                      + b_pad * (cls_pad + out_pad) * f32b)
    cost = pl.CostEstimate(flops=int(flops),
                           transcendentals=int(transcendentals),
                           bytes_accessed=int(bytes_accessed))

    kernel = functools.partial(freq_encoder_kernel, seq_len=T, hid_pad=hid_pad)

    logits_p, xa_p = pl.pallas_call(
        kernel,
        out_shape=out_shape,
        grid_spec=pltpu.PrefetchScalarGridSpec(
            num_scalar_prefetch=0,
            grid=grid,
            in_specs=in_specs,
            out_specs=out_specs,
        ),
        compiler_params=pltpu.CompilerParams(
            dimension_semantics=("parallel",),    # batch axis shards across TCs (v7x)
            vmem_limit_bytes=vmem_limit),
        cost_estimate=cost,
    )(x_tiles, *weights)

    return logits_p[:B, :NUM_CLASSES], xa_p[:B, :OUT]


def make_params(key, n_samples, lstm_size=32, output_size=32):
    """Deterministic init matching FreqEncoder layer shapes.

    Weights are stored as (in, out) = transpose of PyTorch's (out, in) layout;
    the LSTM's two biases are pre-summed into one (1, 4H) vector."""
    K = min(HALF_SPECTRUM_HI - 1, n_samples - 1)   # LSTM input_size
    H = lstm_size

    def uniform(k, shape, fan):
        bound = 1.0 / jnp.sqrt(fan)
        return jax.random.uniform(k, shape, jnp.float32, -bound, bound)

    key, k1, k2, k3, k4, k5, k6, k7, k8 = jax.random.split(key, 9)
    w_ih = uniform(k1, (K, 4 * H), H)              # PyTorch LSTM init ~ U(-1/sqrt(H), 1/sqrt(H))
    w_hh = uniform(k2, (H, 4 * H), H)
    b_lstm = uniform(k3, (1, 4 * H), H) + uniform(k4, (1, 4 * H), H)
    w_out = uniform(k5, (H, output_size), H)
    b_out = uniform(k6, (1, output_size), H)
    w_cls = uniform(k7, (output_size, NUM_CLASSES), output_size)
    b_cls = uniform(k8, (1, NUM_CLASSES), output_size)
    return {"lstm": (w_ih, w_hh, b_lstm),
            "output": (w_out, b_out),
            "classifier": (w_cls, b_cls)}


def freq_encoder_ref(x, params):
    """Pure-JAX reference (jnp.fft + scanned LSTM) for correctness checking."""
    hp = jax.lax.Precision.HIGHEST
    w_ih, w_hh, b_lstm = params["lstm"]
    w_out, b_out = params["output"]
    w_cls, b_cls = params["classifier"]
    H = w_hh.shape[0]
    B = x.shape[0]

    spec = jnp.fft.fft(x.astype(jnp.float32), axis=-1)
    amp = jnp.abs(spec[:, :, 1:HALF_SPECTRUM_HI]).astype(jnp.float32)   # (B, T, K)

    def step(carry, xt):
        h, c = carry
        g = (jnp.dot(xt, w_ih, precision=hp)
             + jnp.dot(h, w_hh, precision=hp) + b_lstm)
        i_g = jax.nn.sigmoid(g[:, 0 * H:1 * H])
        f_g = jax.nn.sigmoid(g[:, 1 * H:2 * H])
        g_g = jnp.tanh(g[:, 2 * H:3 * H])
        o_g = jax.nn.sigmoid(g[:, 3 * H:4 * H])
        c = f_g * c + i_g * g_g
        h = o_g * jnp.tanh(c)
        return (h, c), None

    init = (jnp.zeros((B, H), jnp.float32), jnp.zeros((B, H), jnp.float32))
    (h, _), _ = jax.lax.scan(step, init, jnp.swapaxes(amp, 0, 1))

    xa = jax.nn.relu(jnp.dot(h, w_out, precision=hp) + b_out)
    logits = jnp.dot(xa, w_cls, precision=hp) + b_cls
    return logits, xa


if __name__ == "__main__":
    batch, seq, n_samples = 4, 8, 64
    lstm_size, output_size = 32, 32

    key = jax.random.PRNGKey(0)
    key, kx = jax.random.split(key)
    x = jax.random.normal(kx, (batch, seq, n_samples), jnp.float32)

    params = make_params(key, n_samples, lstm_size=lstm_size,
                         output_size=output_size)

    ref_logits, ref_xa = freq_encoder_ref(x, params)

    # Strict numerical check with f32 MXU operands.
    logits, xa = freq_encoder_forward(x, params, mxu_dtype=jnp.float32)
    logits = jax.block_until_ready(logits)
    xa = jax.block_until_ready(xa)
    assert logits.shape == (batch, NUM_CLASSES)
    assert xa.shape == (batch, output_size)
    assert jnp.allclose(xa, ref_xa, atol=5e-3, rtol=5e-3)
    assert jnp.allclose(logits, ref_logits, atol=5e-3, rtol=5e-3)

    # Default (bandwidth-optimized) path: bf16 x / DFT operands, f32 accumulation.
    logits_bf, xa_bf = freq_encoder_forward(x, params)
    logits_bf = jax.block_until_ready(logits_bf)
    xa_bf = jax.block_until_ready(xa_bf)
    assert jnp.allclose(xa_bf, ref_xa, atol=0.25, rtol=0.05)
    assert jnp.allclose(logits_bf, ref_logits, atol=0.25, rtol=0.05)

    print("KERNEL_OK")
</pallas_src>

<mosaic_0001>
module attributes {stable_mosaic.version = 11 : i64} {
  func.func @freq_encoder_kernel(%arg0: i32, %arg1: memref<1x64x128xf32, #tpu.memory_space<vmem>>, %arg2: memref<128x256xf32, #tpu.memory_space<vmem>>, %arg3: memref<128x512xf32, #tpu.memory_space<vmem>>, %arg4: memref<128x512xf32, #tpu.memory_space<vmem>>, %arg5: memref<1x512xf32, #tpu.memory_space<vmem>>, %arg6: memref<128x128xf32, #tpu.memory_space<vmem>>, %arg7: memref<1x128xf32, #tpu.memory_space<vmem>>, %arg8: memref<128x128xf32, #tpu.memory_space<vmem>>, %arg9: memref<1x128xf32, #tpu.memory_space<vmem>>, %arg10: memref<8x128xf32, #tpu.memory_space<vmem>>, %arg11: memref<8x128xf32, #tpu.memory_space<vmem>>) attributes {dimension_semantics = [#tpu.dimension_semantics<parallel>], iteration_bounds = array<i64: 1>, scalar_prefetch = 0 : i64, scratch_operands = 0 : i64, tpu.core_type = #tpu.core_type<tc>, window_params = [{transform_indices = @transform_0, window_bounds = array<i64: 1, 64, 128>}, {pipeline_mode = #tpu.pipeline_mode<synchronous>, transform_indices = @transform_1, window_bounds = array<i64: 128, 256>}, {pipeline_mode = #tpu.pipeline_mode<synchronous>, transform_indices = @transform_2, window_bounds = array<i64: 128, 512>}, {pipeline_mode = #tpu.pipeline_mode<synchronous>, transform_indices = @transform_3, window_bounds = array<i64: 128, 512>}, {pipeline_mode = #tpu.pipeline_mode<synchronous>, transform_indices = @transform_4, window_bounds = array<i64: 1, 512>}, {pipeline_mode = #tpu.pipeline_mode<synchronous>, transform_indices = @transform_5, window_bounds = array<i64: 128, 128>}, {pipeline_mode = #tpu.pipeline_mode<synchronous>, transform_indices = @transform_6, window_bounds = array<i64: 1, 128>}, {pipeline_mode = #tpu.pipeline_mode<synchronous>, transform_indices = @transform_7, window_bounds = array<i64: 128, 128>}, {pipeline_mode = #tpu.pipeline_mode<synchronous>, transform_indices = @transform_8, window_bounds = array<i64: 1, 128>}, {transform_indices = @transform_9, window_bounds = array<i64: 8, 128>}, {transform_indices = @transform_10, window_bounds = array<i64: 8, 128>}]} {
    %c0 = arith.constant 0 : index
    %c0_0 = arith.constant 0 : index
    %c0_1 = arith.constant 0 : index
    %0 = vector.load %arg1[%c0, %c0_0, %c0_1] : memref<1x64x128xf32, #tpu.memory_space<vmem>>, vector<1x64x128xf32>
    %1 = vector.shape_cast %0 : vector<1x64x128xf32> to vector<64x128xf32>
    %c0_2 = arith.constant 0 : index
    %c0_3 = arith.constant 0 : index
    %2 = vector.load %arg2[%c0_2, %c0_3] : memref<128x256xf32, #tpu.memory_space<vmem>>, vector<128x256xf32>
    %cst = arith.constant dense<0.000000e+00> : vector<64x256xf32>
    %3 = tpu.matmul %1, %2, %cst {dimension_numbers = #tpu.dot_dimension_numbers<[1], [0], [0], [1], [0, 0, 1, 1], [], []>} : vector<64x128xf32>, vector<128x256xf32>, vector<64x256xf32> -> vector<64x256xf32>
    %4 = vector.extract_strided_slice %3 {offsets = [0, 0], sizes = [64, 128], strides = [1, 1]} : vector<64x256xf32> to vector<64x128xf32>
    %5 = vector.extract_strided_slice %3 {offsets = [0, 128], sizes = [64, 128], strides = [1, 1]} : vector<64x256xf32> to vector<64x128xf32>
    %6 = arith.mulf %4, %4 : vector<64x128xf32>
    %7 = arith.mulf %5, %5 : vector<64x128xf32>
    %8 = arith.addf %6, %7 : vector<64x128xf32>
    %9 = math.sqrt %8 : vector<64x128xf32>
    %c0_4 = arith.constant 0 : index
    %c0_5 = arith.constant 0 : index
    %10 = vector.load %arg3[%c0_4, %c0_5] : memref<128x512xf32, #tpu.memory_space<vmem>>, vector<128x512xf32>
    %cst_6 = arith.constant dense<0.000000e+00> : vector<64x512xf32>
    %11 = tpu.matmul %9, %10, %cst_6 {dimension_numbers = #tpu.dot_dimension_numbers<[1], [0], [0], [1], [0, 0, 1, 1], [], []>} : vector<64x128xf32>, vector<128x512xf32>, vector<64x512xf32> -> vector<64x512xf32>
    %c0_7 = arith.constant 0 : index
    %c0_8 = arith.constant 0 : index
    %12 = vector.load %arg5[%c0_7, %c0_8] : memref<1x512xf32, #tpu.memory_space<vmem>>, vector<1x512xf32>
    %13 = vector.broadcast %12 : vector<1x512xf32> to vector<64x512xf32>
    %14 = arith.addf %11, %13 : vector<64x512xf32>
    %15 = vector.shape_cast %14 : vector<64x512xf32> to vector<8x8x512xf32>
    %c0_9 = arith.constant 0 : index
    %c0_10 = arith.constant 0 : index
    %16 = vector.load %arg4[%c0_9, %c0_10] : memref<128x512xf32, #tpu.memory_space<vmem>>, vector<128x512xf32>
    %cst_11 = arith.constant 0.000000e+00 : f32
    %17 = vector.broadcast %cst_11 : f32 to vector<8x128xf32>
    %cst_12 = arith.constant 0.000000e+00 : f32
    %18 = vector.broadcast %cst_12 : f32 to vector<8x128xf32>
    %19 = vector.extract_strided_slice %15 {offsets = [0, 0, 0], sizes = [1, 8, 512], strides = [1, 1, 1]} : vector<8x8x512xf32> to vector<1x8x512xf32>
    %20 = vector.shape_cast %19 : vector<1x8x512xf32> to vector<8x512xf32>
    %cst_13 = arith.constant dense<0.000000e+00> : vector<8x512xf32>
    %21 = tpu.matmul %17, %16, %cst_13 {dimension_numbers = #tpu.dot_dimension_numbers<[1], [0], [0], [1], [0, 0, 1, 1], [], []>} : vector<8x128xf32>, vector<128x512xf32>, vector<8x512xf32> -> vector<8x512xf32>
    %22 = arith.addf %20, %21 : vector<8x512xf32>
    %23 = vector.extract_strided_slice %22 {offsets = [0, 0], sizes = [8, 128], strides = [1, 1]} : vector<8x512xf32> to vector<8x128xf32>
    %24 = arith.negf %23 : vector<8x128xf32>
    %25 = math.exp %24 : vector<8x128xf32>
    %cst_14 = arith.constant 1.000000e+00 : f32
    %26 = vector.broadcast %cst_14 : f32 to vector<8x128xf32>
    %27 = arith.addf %26, %25 : vector<8x128xf32>
    %28 = arith.divf %26, %27 : vector<8x128xf32>
    %29 = vector.extract_strided_slice %22 {offsets = [0, 128], sizes = [8, 128], strides = [1, 1]} : vector<8x512xf32> to vector<8x128xf32>
    %30 = arith.negf %29 : vector<8x128xf32>
    %31 = math.exp %30 : vector<8x128xf32>
    %cst_15 = arith.constant 1.000000e+00 : f32
    %32 = vector.broadcast %cst_15 : f32 to vector<8x128xf32>
    %33 = arith.addf %32, %31 : vector<8x128xf32>
    %34 = arith.divf %32, %33 : vector<8x128xf32>
    %35 = vector.extract_strided_slice %22 {offsets = [0, 256], sizes = [8, 128], strides = [1, 1]} : vector<8x512xf32> to vector<8x128xf32>
    %36 = math.tanh %35 : vector<8x128xf32>
    %37 = vector.extract_strided_slice %22 {offsets = [0, 384], sizes = [8, 128], strides = [1, 1]} : vector<8x512xf32> to vector<8x128xf32>
    %38 = arith.negf %37 : vector<8x128xf32>
    %39 = math.exp %38 : vector<8x128xf32>
    %cst_16 = arith.constant 1.000000e+00 : f32
    %40 = vector.broadcast %cst_16 : f32 to vector<8x128xf32>
    %41 = arith.addf %40, %39 : vector<8x128xf32>
    %42 = arith.divf %40, %41 : vector<8x128xf32>
    %43 = arith.mulf %34, %18 : vector<8x128xf32>
    %44 = arith.mulf %28, %36 : vector<8x128xf32>
    %45 = arith.addf %43, %44 : vector<8x128xf32>
    %46 = math.tanh %45 : vector<8x128xf32>
    %47 = arith.mulf %42, %46 : vector<8x128xf32>
    %48 = vector.extract_strided_slice %15 {offsets = [1, 0, 0], sizes = [1, 8, 512], strides = [1, 1, 1]} : vector<8x8x512xf32> to vector<1x8x512xf32>
    %49 = vector.shape_cast %48 : vector<1x8x512xf32> to vector<8x512xf32>
    %cst_17 = arith.constant dense<0.000000e+00> : vector<8x512xf32>
    %50 = tpu.matmul %47, %16, %cst_17 {dimension_numbers = #tpu.dot_dimension_numbers<[1], [0], [0], [1], [0, 0, 1, 1], [], []>} : vector<8x128xf32>, vector<128x512xf32>, vector<8x512xf32> -> vector<8x512xf32>
    %51 = arith.addf %49, %50 : vector<8x512xf32>
    %52 = vector.extract_strided_slice %51 {offsets = [0, 0], sizes = [8, 128], strides = [1, 1]} : vector<8x512xf32> to vector<8x128xf32>
    %53 = arith.negf %52 : vector<8x128xf32>
    %54 = math.exp %53 : vector<8x128xf32>
    %cst_18 = arith.constant 1.000000e+00 : f32
    %55 = vector.broadcast %cst_18 : f32 to vector<8x128xf32>
    %56 = arith.addf %55, %54 : vector<8x128xf32>
    %57 = arith.divf %55, %56 : vector<8x128xf32>
    %58 = vector.extract_strided_slice %51 {offsets = [0, 128], sizes = [8, 128], strides = [1, 1]} : vector<8x512xf32> to vector<8x128xf32>
    %59 = arith.negf %58 : vector<8x128xf32>
    %60 = math.exp %59 : vector<8x128xf32>
    %cst_19 = arith.constant 1.000000e+00 : f32
    %61 = vector.broadcast %cst_19 : f32 to vector<8x128xf32>
    %62 = arith.addf %61, %60 : vector<8x128xf32>
    %63 = arith.divf %61, %62 : vector<8x128xf32>
    %64 = vector.extract_strided_slice %51 {offsets = [0, 256], sizes = [8, 128], strides = [1, 1]} : vector<8x512xf32> to vector<8x128xf32>
    %65 = math.tanh %64 : vector<8x128xf32>
    %66 = vector.extract_strided_slice %51 {offsets = [0, 384], sizes = [8, 128], strides = [1, 1]} : vector<8x512xf32> to vector<8x128xf32>
    %67 = arith.negf %66 : vector<8x128xf32>
    %68 = math.exp %67 : vector<8x128xf32>
    %cst_20 = arith.constant 1.000000e+00 : f32
    %69 = vector.broadcast %cst_20 : f32 to vector<8x128xf32>
    %70 = arith.addf %69, %68 : vector<8x128xf32>
    %71 = arith.divf %69, %70 : vector<8x128xf32>
    %72 = arith.mulf %63, %45 : vector<8x128xf32>
    %73 = arith.mulf %57, %65 : vector<8x128xf32>
    %74 = arith.addf %72, %73 : vector<8x128xf32>
    %75 = math.tanh %74 : vector<8x128xf32>
    %76 = arith.mulf %71, %75 : vector<8x128xf32>
    %77 = vector.extract_strided_slice %15 {offsets = [2, 0, 0], sizes = [1, 8, 512], strides = [1, 1, 1]} : vector<8x8x512xf32> to vector<1x8x512xf32>
    %78 = vector.shape_cast %77 : vector<1x8x512xf32> to vector<8x512xf32>
    %cst_21 = arith.constant dense<0.000000e+00> : vector<8x512xf32>
    %79 = tpu.matmul %76, %16, %cst_21 {dimension_numbers = #tpu.dot_dimension_numbers<[1], [0], [0], [1], [0, 0, 1, 1], [], []>} : vector<8x128xf32>, vector<128x512xf32>, vector<8x512xf32> -> vector<8x512xf32>
    %80 = arith.addf %78, %79 : vector<8x512xf32>
    %81 = vector.extract_strided_slice %80 {offsets = [0, 0], sizes = [8, 128], strides = [1, 1]} : vector<8x512xf32> to vector<8x128xf32>
    %82 = arith.negf %81 : vector<8x128xf32>
    %83 = math.exp %82 : vector<8x128xf32>
    %cst_22 = arith.constant 1.000000e+00 : f32
    %84 = vector.broadcast %cst_22 : f32 to vector<8x128xf32>
    %85 = arith.addf %84, %83 : vector<8x128xf32>
    %86 = arith.divf %84, %85 : vector<8x128xf32>
    %87 = vector.extract_strided_slice %80 {offsets = [0, 128], sizes = [8, 128], strides = [1, 1]} : vector<8x512xf32> to vector<8x128xf32>
    %88 = arith.negf %87 : vector<8x128xf32>
    %89 = math.exp %88 : vector<8x128xf32>
    %cst_23 = arith.constant 1.000000e+00 : f32
    %90 = vector.broadcast %cst_23 : f32 to vector<8x128xf32>
    %91 = arith.addf %90, %89 : vector<8x128xf32>
    %92 = arith.divf %90, %91 : vector<8x128xf32>
    %93 = vector.extract_strided_slice %80 {offsets = [0, 256], sizes = [8, 128], strides = [1, 1]} : vector<8x512xf32> to vector<8x128xf32>
    %94 = math.tanh %93 : vector<8x128xf32>
    %95 = vector.extract_strided_slice %80 {offsets = [0, 384], sizes = [8, 128], strides = [1, 1]} : vector<8x512xf32> to vector<8x128xf32>
    %96 = arith.negf %95 : vector<8x128xf32>
    %97 = math.exp %96 : vector<8x128xf32>
    %cst_24 = arith.constant 1.000000e+00 : f32
    %98 = vector.broadcast %cst_24 : f32 to vector<8x128xf32>
    %99 = arith.addf %98, %97 : vector<8x128xf32>
    %100 = arith.divf %98, %99 : vector<8x128xf32>
    %101 = arith.mulf %92, %74 : vector<8x128xf32>
    %102 = arith.mulf %86, %94 : vector<8x128xf32>
    %103 = arith.addf %101, %102 : vector<8x128xf32>
    %104 = math.tanh %103 : vector<8x128xf32>
    %105 = arith.mulf %100, %104 : vector<8x128xf32>
    %106 = vector.extract_strided_slice %15 {offsets = [3, 0, 0], sizes = [1, 8, 512], strides = [1, 1, 1]} : vector<8x8x512xf32> to vector<1x8x512xf32>
    %107 = vector.shape_cast %106 : vector<1x8x512xf32> to vector<8x512xf32>
    %cst_25 = arith.constant dense<0.000000e+00> : vector<8x512xf32>
    %108 = tpu.matmul %105, %16, %cst_25 {dimension_numbers = #tpu.dot_dimension_numbers<[1], [0], [0], [1], [0, 0, 1, 1], [], []>} : vector<8x128xf32>, vector<128x512xf32>, vector<8x512xf32> -> vector<8x512xf32>
    %109 = arith.addf %107, %108 : vector<8x512xf32>
    %110 = vector.extract_strided_slice %109 {offsets = [0, 0], sizes = [8, 128], strides = [1, 1]} : vector<8x512xf32> to vector<8x128xf32>
    %111 = arith.negf %110 : vector<8x128xf32>
    %112 = math.exp %111 : vector<8x128xf32>
    %cst_26 = arith.constant 1.000000e+00 : f32
    %113 = vector.broadcast %cst_26 : f32 to vector<8x128xf32>
    %114 = arith.addf %113, %112 : vector<8x128xf32>
    %115 = arith.divf %113, %114 : vector<8x128xf32>
    %116 = vector.extract_strided_slice %109 {offsets = [0, 128], sizes = [8, 128], strides = [1, 1]} : vector<8x512xf32> to vector<8x128xf32>
    %117 = arith.negf %116 : vector<8x128xf32>
    %118 = math.exp %117 : vector<8x128xf32>
    %cst_27 = arith.constant 1.000000e+00 : f32
    %119 = vector.broadcast %cst_27 : f32 to vector<8x128xf32>
    %120 = arith.addf %119, %118 : vector<8x128xf32>
    %121 = arith.divf %119, %120 : vector<8x128xf32>
    %122 = vector.extract_strided_slice %109 {offsets = [0, 256], sizes = [8, 128], strides = [1, 1]} : vector<8x512xf32> to vector<8x128xf32>
    %123 = math.tanh %122 : vector<8x128xf32>
    %124 = vector.extract_strided_slice %109 {offsets = [0, 384], sizes = [8, 128], strides = [1, 1]} : vector<8x512xf32> to vector<8x128xf32>
    %125 = arith.negf %124 : vector<8x128xf32>
    %126 = math.exp %125 : vector<8x128xf32>
    %cst_28 = arith.constant 1.000000e+00 : f32
    %127 = vector.broadcast %cst_28 : f32 to vector<8x128xf32>
    %128 = arith.addf %127, %126 : vector<8x128xf32>
    %129 = arith.divf %127, %128 : vector<8x128xf32>
    %130 = arith.mulf %121, %103 : vector<8x128xf32>
    %131 = arith.mulf %115, %123 : vector<8x128xf32>
    %132 = arith.addf %130, %131 : vector<8x128xf32>
    %133 = math.tanh %132 : vector<8x128xf32>
    %134 = arith.mulf %129, %133 : vector<8x128xf32>
    %135 = vector.extract_strided_slice %15 {offsets = [4, 0, 0], sizes = [1, 8, 512], strides = [1, 1, 1]} : vector<8x8x512xf32> to vector<1x8x512xf32>
    %136 = vector.shape_cast %135 : vector<1x8x512xf32> to vector<8x512xf32>
    %cst_29 = arith.constant dense<0.000000e+00> : vector<8x512xf32>
    %137 = tpu.matmul %134, %16, %cst_29 {dimension_numbers = #tpu.dot_dimension_numbers<[1], [0], [0], [1], [0, 0, 1, 1], [], []>} : vector<8x128xf32>, vector<128x512xf32>, vector<8x512xf32> -> vector<8x512xf32>
    %138 = arith.addf %136, %137 : vector<8x512xf32>
    %139 = vector.extract_strided_slice %138 {offsets = [0, 0], sizes = [8, 128], strides = [1, 1]} : vector<8x512xf32> to vector<8x128xf32>
    %140 = arith.negf %139 : vector<8x128xf32>
    %141 = math.exp %140 : vector<8x128xf32>
    %cst_30 = arith.constant 1.000000e+00 : f32
    %142 = vector.broadcast %cst_30 : f32 to vector<8x128xf32>
    %143 = arith.addf %142, %141 : vector<8x128xf32>
    %144 = arith.divf %142, %143 : vector<8x128xf32>
    %145 = vector.extract_strided_slice %138 {offsets = [0, 128], sizes = [8, 128], strides = [1, 1]} : vector<8x512xf32> to vector<8x128xf32>
    %146 = arith.negf %145 : vector<8x128xf32>
    %147 = math.exp %146 : vector<8x128xf32>
    %cst_31 = arith.constant 1.000000e+00 : f32
    %148 = vector.broadcast %cst_31 : f32 to vector<8x128xf32>
    %149 = arith.addf %148, %147 : vector<8x128xf32>
    %150 = arith.divf %148, %149 : vector<8x128xf32>
    %151 = vector.extract_strided_slice %138 {offsets = [0, 256], sizes = [8, 128], strides = [1, 1]} : vector<8x512xf32> to vector<8x128xf32>
    %152 = math.tanh %151 : vector<8x128xf32>
    %153 = vector.extract_strided_slice %138 {offsets = [0, 384], sizes = [8, 128], strides = [1, 1]} : vector<8x512xf32> to vector<8x128xf32>
    %154 = arith.negf %153 : vector<8x128xf32>
    %155 = math.exp %154 : vector<8x128xf32>
    %cst_32 = arith.constant 1.000000e+00 : f32
    %156 = vector.broadcast %cst_32 : f32 to vector<8x128xf32>
    %157 = arith.addf %156, %155 : vector<8x128xf32>
    %158 = arith.divf %156, %157 : vector<8x128xf32>
    %159 = arith.mulf %150, %132 : vector<8x128xf32>
    %160 = arith.mulf %144, %152 : vector<8x128xf32>
    %161 = arith.addf %159, %160 : vector<8x128xf32>
    %162 = math.tanh %161 : vector<8x128xf32>
    %163 = arith.mulf %158, %162 : vector<8x128xf32>
    %164 = vector.extract_strided_slice %15 {offsets = [5, 0, 0], sizes = [1, 8, 512], strides = [1, 1, 1]} : vector<8x8x512xf32> to vector<1x8x512xf32>
    %165 = vector.shape_cast %164 : vector<1x8x512xf32> to vector<8x512xf32>
    %cst_33 = arith.constant dense<0.000000e+00> : vector<8x512xf32>
    %166 = tpu.matmul %163, %16, %cst_33 {dimension_numbers = #tpu.dot_dimension_numbers<[1], [0], [0], [1], [0, 0, 1, 1], [], []>} : vector<8x128xf32>, vector<128x512xf32>, vector<8x512xf32> -> vector<8x512xf32>
    %167 = arith.addf %165, %166 : vector<8x512xf32>
    %168 = vector.extract_strided_slice %167 {offsets = [0, 0], sizes = [8, 128], strides = [1, 1]} : vector<8x512xf32> to vector<8x128xf32>
    %169 = arith.negf %168 : vector<8x128xf32>
    %170 = math.exp %169 : vector<8x128xf32>
    %cst_34 = arith.constant 1.000000e+00 : f32
    %171 = vector.broadcast %cst_34 : f32 to vector<8x128xf32>
    %172 = arith.addf %171, %170 : vector<8x128xf32>
    %173 = arith.divf %171, %172 : vector<8x128xf32>
    %174 = vector.extract_strided_slice %167 {offsets = [0, 128], sizes = [8, 128], strides = [1, 1]} : vector<8x512xf32> to vector<8x128xf32>
    %175 = arith.negf %174 : vector<8x128xf32>
    %176 = math.exp %175 : vector<8x128xf32>
    %cst_35 = arith.constant 1.000000e+00 : f32
    %177 = vector.broadcast %cst_35 : f32 to vector<8x128xf32>
    %178 = arith.addf %177, %176 : vector<8x128xf32>
    %179 = arith.divf %177, %178 : vector<8x128xf32>
    %180 = vector.extract_strided_slice %167 {offsets = [0, 256], sizes = [8, 128], strides = [1, 1]} : vector<8x512xf32> to vector<8x128xf32>
    %181 = math.tanh %180 : vector<8x128xf32>
    %182 = vector.extract_strided_slice %167 {offsets = [0, 384], sizes = [8, 128], strides = [1, 1]} : vector<8x512xf32> to vector<8x128xf32>
    %183 = arith.negf %182 : vector<8x128xf32>
    %184 = math.exp %183 : vector<8x128xf32>
    %cst_36 = arith.constant 1.000000e+00 : f32
    %185 = vector.broadcast %cst_36 : f32 to vector<8x128xf32>
    %186 = arith.addf %185, %184 : vector<8x128xf32>
    %187 = arith.divf %185, %186 : vector<8x128xf32>
    %188 = arith.mulf %179, %161 : vector<8x128xf32>
    %189 = arith.mulf %173, %181 : vector<8x128xf32>
    %190 = arith.addf %188, %189 : vector<8x128xf32>
    %191 = math.tanh %190 : vector<8x128xf32>
    %192 = arith.mulf %187, %191 : vector<8x128xf32>
    %193 = vector.extract_strided_slice %15 {offsets = [6, 0, 0], sizes = [1, 8, 512], strides = [1, 1, 1]} : vector<8x8x512xf32> to vector<1x8x512xf32>
    %194 = vector.shape_cast %193 : vector<1x8x512xf32> to vector<8x512xf32>
    %cst_37 = arith.constant dense<0.000000e+00> : vector<8x512xf32>
    %195 = tpu.matmul %192, %16, %cst_37 {dimension_numbers = #tpu.dot_dimension_numbers<[1], [0], [0], [1], [0, 0, 1, 1], [], []>} : vector<8x128xf32>, vector<128x512xf32>, vector<8x512xf32> -> vector<8x512xf32>
    %196 = arith.addf %194, %195 : vector<8x512xf32>
    %197 = vector.extract_strided_slice %196 {offsets = [0, 0], sizes = [8, 128], strides = [1, 1]} : vector<8x512xf32> to vector<8x128xf32>
    %198 = arith.negf %197 : vector<8x128xf32>
    %199 = math.exp %198 : vector<8x128xf32>
    %cst_38 = arith.constant 1.000000e+00 : f32
    %200 = vector.broadcast %cst_38 : f32 to vector<8x128xf32>
    %201 = arith.addf %200, %199 : vector<8x128xf32>
    %202 = arith.divf %200, %201 : vector<8x128xf32>
    %203 = vector.extract_strided_slice %196 {offsets = [0, 128], sizes = [8, 128], strides = [1, 1]} : vector<8x512xf32> to vector<8x128xf32>
    %204 = arith.negf %203 : vector<8x128xf32>
    %205 = math.exp %204 : vector<8x128xf32>
    %cst_39 = arith.constant 1.000000e+00 : f32
    %206 = vector.broadcast %cst_39 : f32 to vector<8x128xf32>
    %207 = arith.addf %206, %205 : vector<8x128xf32>
    %208 = arith.divf %206, %207 : vector<8x128xf32>
    %209 = vector.extract_strided_slice %196 {offsets = [0, 256], sizes = [8, 128], strides = [1, 1]} : vector<8x512xf32> to vector<8x128xf32>
    %210 = math.tanh %209 : vector<8x128xf32>
    %211 = vector.extract_strided_slice %196 {offsets = [0, 384], sizes = [8, 128], strides = [1, 1]} : vector<8x512xf32> to vector<8x128xf32>
    %212 = arith.negf %211 : vector<8x128xf32>
    %213 = math.exp %212 : vector<8x128xf32>
    %cst_40 = arith.constant 1.000000e+00 : f32
    %214 = vector.broadcast %cst_40 : f32 to vector<8x128xf32>
    %215 = arith.addf %214, %213 : vector<8x128xf32>
    %216 = arith.divf %214, %215 : vector<8x128xf32>
    %217 = arith.mulf %208, %190 : vector<8x128xf32>
    %218 = arith.mulf %202, %210 : vector<8x128xf32>
    %219 = arith.addf %217, %218 : vector<8x128xf32>
    %220 = math.tanh %219 : vector<8x128xf32>
    %221 = arith.mulf %216, %220 : vector<8x128xf32>
    %222 = vector.extract_strided_slice %15 {offsets = [7, 0, 0], sizes = [1, 8, 512], strides = [1, 1, 1]} : vector<8x8x512xf32> to vector<1x8x512xf32>
    %223 = vector.shape_cast %222 : vector<1x8x512xf32> to vector<8x512xf32>
    %cst_41 = arith.constant dense<0.000000e+00> : vector<8x512xf32>
    %224 = tpu.matmul %221, %16, %cst_41 {dimension_numbers = #tpu.dot_dimension_numbers<[1], [0], [0], [1], [0, 0, 1, 1], [], []>} : vector<8x128xf32>, vector<128x512xf32>, vector<8x512xf32> -> vector<8x512xf32>
    %225 = arith.addf %223, %224 : vector<8x512xf32>
    %226 = vector.extract_strided_slice %225 {offsets = [0, 0], sizes = [8, 128], strides = [1, 1]} : vector<8x512xf32> to vector<8x128xf32>
    %227 = arith.negf %226 : vector<8x128xf32>
    %228 = math.exp %227 : vector<8x128xf32>
    %cst_42 = arith.constant 1.000000e+00 : f32
    %229 = vector.broadcast %cst_42 : f32 to vector<8x128xf32>
    %230 = arith.addf %229, %228 : vector<8x128xf32>
    %231 = arith.divf %229, %230 : vector<8x128xf32>
    %232 = vector.extract_strided_slice %225 {offsets = [0, 128], sizes = [8, 128], strides = [1, 1]} : vector<8x512xf32> to vector<8x128xf32>
    %233 = arith.negf %232 : vector<8x128xf32>
    %234 = math.exp %233 : vector<8x128xf32>
    %cst_43 = arith.constant 1.000000e+00 : f32
    %235 = vector.broadcast %cst_43 : f32 to vector<8x128xf32>
    %236 = arith.addf %235, %234 : vector<8x128xf32>
    %237 = arith.divf %235, %236 : vector<8x128xf32>
    %238 = vector.extract_strided_slice %225 {offsets = [0, 256], sizes = [8, 128], strides = [1, 1]} : vector<8x512xf32> to vector<8x128xf32>
    %239 = math.tanh %238 : vector<8x128xf32>
    %240 = vector.extract_strided_slice %225 {offsets = [0, 384], sizes = [8, 128], strides = [1, 1]} : vector<8x512xf32> to vector<8x128xf32>
    %241 = arith.negf %240 : vector<8x128xf32>
    %242 = math.exp %241 : vector<8x128xf32>
    %cst_44 = arith.constant 1.000000e+00 : f32
    %243 = vector.broadcast %cst_44 : f32 to vector<8x128xf32>
    %244 = arith.addf %243, %242 : vector<8x128xf32>
    %245 = arith.divf %243, %244 : vector<8x128xf32>
    %246 = arith.mulf %237, %219 : vector<8x128xf32>
    %247 = arith.mulf %231, %239 : vector<8x128xf32>
    %248 = arith.addf %246, %247 : vector<8x128xf32>
    %249 = math.tanh %248 : vector<8x128xf32>
    %250 = arith.mulf %245, %249 : vector<8x128xf32>
    %c0_45 = arith.constant 0 : index
    %c0_46 = arith.constant 0 : index
    %251 = vector.load %arg6[%c0_45, %c0_46] : memref<128x128xf32, #tpu.memory_space<vmem>>, vector<128x128xf32>
    %cst_47 = arith.constant dense<0.000000e+00> : vector<8x128xf32>
    %252 = tpu.matmul %250, %251, %cst_47 {dimension_numbers = #tpu.dot_dimension_numbers<[1], [0], [0], [1], [0, 0, 1, 1], [], []>} : vector<8x128xf32>, vector<128x128xf32>, vector<8x128xf32> -> vector<8x128xf32>
    %c0_48 = arith.constant 0 : index
    %c0_49 = arith.constant 0 : index
    %253 = vector.load %arg7[%c0_48, %c0_49] : memref<1x128xf32, #tpu.memory_space<vmem>>, vector<1x128xf32>
    %254 = vector.broadcast %253 : vector<1x128xf32> to vector<8x128xf32>
    %255 = arith.addf %252, %254 : vector<8x128xf32>
    %cst_50 = arith.constant 0.000000e+00 : f32
    %256 = vector.broadcast %cst_50 : f32 to vector<8x128xf32>
    %257 = arith.maximumf %255, %256 : vector<8x128xf32>
    %c0_51 = arith.constant 0 : index
    %c0_52 = arith.constant 0 : index
    %258 = vector.load %arg8[%c0_51, %c0_52] : memref<128x128xf32, #tpu.memory_space<vmem>>, vector<128x128xf32>
    %cst_53 = arith.constant dense<0.000000e+00> : vector<8x128xf32>
    %259 = tpu.matmul %257, %258, %cst_53 {dimension_numbers = #tpu.dot_dimension_numbers<[1], [0], [0], [1], [0, 0, 1, 1], [], []>} : vector<8x128xf32>, vector<128x128xf32>, vector<8x128xf32> -> vector<8x128xf32>
    %c0_54 = arith.constant 0 : index
    %c0_55 = arith.constant 0 : index
    %260 = vector.load %arg9[%c0_54, %c0_55] : memref<1x128xf32, #tpu.memory_space<vmem>>, vector<1x128xf32>
    %261 = vector.broadcast %260 : vector<1x128xf32> to vector<8x128xf32>
    %262 = arith.addf %259, %261 : vector<8x128xf32>
    %c0_56 = arith.constant 0 : index
    %c0_57 = arith.constant 0 : index
    %263 = vector.load %arg11[%c0_56, %c0_57] : memref<8x128xf32, #tpu.memory_space<vmem>>, vector<8x128xf32>
    tpu.vector_store %arg11[%c0_56, %c0_57], %257 {strides = array<i32>} : memref<8x128xf32, #tpu.memory_space<vmem>>, vector<8x128xf32>,
    %c0_58 = arith.constant 0 : index
    %c0_59 = arith.constant 0 : index
    %264 = vector.load %arg10[%c0_58, %c0_59] : memref<8x128xf32, #tpu.memory_space<vmem>>, vector<8x128xf32>
    tpu.vector_store %arg10[%c0_58, %c0_59], %262 {strides = array<i32>} : memref<8x128xf32, #tpu.memory_space<vmem>>, vector<8x128xf32>,
    return
  }
  func.func @transform_0(%arg0: i32) -> (i32, i32, i32) {
    %c0_i32 = arith.constant 0 : i32
    %c0_i32_0 = arith.constant 0 : i32
    %c0_i32_1 = arith.constant 0 : i32
    return %arg0, %c0_i32, %c0_i32_0 : i32, i32, i32
  }
  func.func @transform_1(%arg0: i32) -> (i32, i32) {
    %c0_i32 = arith.constant 0 : i32
    %c0_i32_0 = arith.constant 0 : i32
    %c0_i32_1 = arith.constant 0 : i32
    return %c0_i32, %c0_i32_0 : i32, i32
  }
  func.func @transform_2(%arg0: i32) -> (i32, i32) {
    %c0_i32 = arith.constant 0 : i32
    %c0_i32_0 = arith.constant 0 : i32
    %c0_i32_1 = arith.constant 0 : i32
    return %c0_i32, %c0_i32_0 : i32, i32
  }
  func.func @transform_3(%arg0: i32) -> (i32, i32) {
    %c0_i32 = arith.constant 0 : i32
    %c0_i32_0 = arith.constant 0 : i32
    %c0_i32_1 = arith.constant 0 : i32
    return %c0_i32, %c0_i32_0 : i32, i32
  }
  func.func @transform_4(%arg0: i32) -> (i32, i32) {
    %c0_i32 = arith.constant 0 : i32
    %c0_i32_0 = arith.constant 0 : i32
    %c0_i32_1 = arith.constant 0 : i32
    return %c0_i32, %c0_i32_0 : i32, i32
  }
  func.func @transform_5(%arg0: i32) -> (i32, i32) {
    %c0_i32 = arith.constant 0 : i32
    %c0_i32_0 = arith.constant 0 : i32
    %c0_i32_1 = arith.constant 0 : i32
    return %c0_i32, %c0_i32_0 : i32, i32
  }
  func.func @transform_6(%arg0: i32) -> (i32, i32) {
    %c0_i32 = arith.constant 0 : i32
    %c0_i32_0 = arith.constant 0 : i32
    %c0_i32_1 = arith.constant 0 : i32
    return %c0_i32, %c0_i32_0 : i32, i32
  }
  func.func @transform_7(%arg0: i32) -> (i32, i32) {
    %c0_i32 = arith.constant 0 : i32
    %c0_i32_0 = arith.constant 0 : i32
    %c0_i32_1 = arith.constant 0 : i32
    return %c0_i32, %c0_i32_0 : i32, i32
  }
  func.func @transform_8(%arg0: i32) -> (i32, i32) {
    %c0_i32 = arith.constant 0 : i32
    %c0_i32_0 = arith.constant 0 : i32
    %c0_i32_1 = arith.constant 0 : i32
    return %c0_i32, %c0_i32_0 : i32, i32
  }
  func.func @transform_9(%arg0: i32) -> (i32, i32) {
    %c0_i32 = arith.constant 0 : i32
    %c0_i32_0 = arith.constant 0 : i32
    return %arg0, %c0_i32 : i32, i32
  }
  func.func @transform_10(%arg0: i32) -> (i32, i32) {
    %c0_i32 = arith.constant 0 : i32
    %c0_i32_0 = arith.constant 0 : i32
    return %arg0, %c0_i32 : i32, i32
  }
}

</mosaic_0001>

<bundles_post_ra>
// kernel: tpu_custom_call.1
= control target key start
LH: loop header
LB: loop body
LE: loop exit
PB: predicated region body
PF: predicated region fallthrough
CT: control target
= control target key end

     0   :  { %16 = vsyncpa [#allocation3], 0  ;;  %s4203_s0 = inlined_call_operand.hbm [shape: f32[1,64,128], index: 0, kind: input, shape index: {}]   ;;  %s4204_s1 = inlined_call_operand.hbm [shape: f32[128,256], index: 1, kind: input, shape index: {}]   ;;  %s4205_s2 = inlined_call_operand.hbm [shape: f32[128,512], index: 2, kind: input, shape index: {}]   ;;  %s4206_s3 = inlined_call_operand.hbm [shape: f32[128,512], index: 3, kind: input, shape index: {}]   ;;  %s4207_s4 = inlined_call_operand.vmem [shape: f32[1,512], index: 4, kind: input, shape index: {}]   ;;  %s4208_s5 = inlined_call_operand.hbm [shape: f32[128,128], index: 5, kind: input, shape index: {}]   ;;  %s4209_s6 = inlined_call_operand.vmem [shape: f32[1,128], index: 6, kind: input, shape index: {}]   ;;  %s4210_s7 = inlined_call_operand.hbm [shape: f32[128,128], index: 7, kind: input, shape index: {}]   ;;  %s4211_s8 = inlined_call_operand.vmem [shape: f32[1,128], index: 8, kind: input, shape index: {}]   ;;  %s4212_s9 = inlined_call_operand.hbm [shape: f32[8,128], index: 9, kind: output, shape index: {0}]   ;;  %s4213_s10 = inlined_call_operand.hbm [shape: f32[8,128], index: 10, kind: output, shape index: {1}]  }
   0x1   :  { %17 = vsyncpa [#allocation6], 0 }
   0x2   :  { %18 = vsyncpa [#allocation9], 0 }
   0x3   :  { %19 = vsyncpa [#allocation12], 0 }
   0x4   :  { %20 = vsyncpa [#allocation4], 0 }
   0x5   :  { %21 = vsyncpa [#allocation15], 0  ;;  %s3507_s13 = smov [#allocation5]   ;;  %s3319_s17 = scalar_lea.hbm %s4204_s1, 4096 }
   0x6   :  { %s39_s14 = sshll.u32 %s3507_s13, 4  ;;  %p3320_p0 = scmp.ne.s32.totalorder %s4204_s1, %s3319_s17  ;;  %s40_s14 = int_to_ptr.vmem [resolvable:$true] %s39_s14 }
   0x7   :  { %p3323_p1 = scmp.lt.u32.totalorder %s3319_s17, %s4204_s1 }
   0x9   :  { %p3325_p2 = pnand %p3323_p1, %p3320_p0 }
   0xb   :  { %3328 = shalt.err (!%p3325_p2)
}
   0xc   :  { %s3329_s22 = scalar_lea.vmem %s40_s14, 4096  ;;  %p3334_p4 = scmp.lt.s32.totalorder %s40_s14, %s40_s14 }
   0xd   :  { %p3330_p3 = scmp.ne.s32.totalorder %s40_s14, %s3329_s22  ;;  %p3335_p5 = scmp.lt.s32.totalorder %s3329_s22, %s3329_s22 }
   0xf   :  { %p3336_p6 = por %p3335_p5, %p3334_p4 }
  0x11   :  { %p3337_p7 = pnand %p3336_p6, %p3330_p3 }
  0x13   :  { %3340 = shalt.err (!%p3337_p7)
}
  0x14   :  { %s3508_s23 = smov 256   ;;  %s3509_s24 = smov 16  }
  0x15   :  { %45 = dma.hbm_to_vmem [thread:$0]  %s4204_s1, 4096, %s40_s14, [#allocation6], %s3508_s23, %s3508_s23, %s3509_s24  }
  0x16   :  { %s3510_s27 = smov [#allocation8]   ;;  %s3511_s29 = smov [#allocation2]  }
  0x17   :  { %s63_s28 = sshll.u32 %s3510_s27, 4  ;;  %s27_s30 = sshll.u32 %s3511_s29, 4  ;;  %s64_s28 = int_to_ptr.vmem [resolvable:$true] %s63_s28  ;;  %s28_s30 = int_to_ptr.vmem [resolvable:$true] %s27_s30 }
  0x18   :  { %s3341_s13 = scalar_lea.hbm %s4206_s3, 8192 }
  0x19   :  { %p3342_p8 = scmp.ne.s32.totalorder %s4206_s3, %s3341_s13  ;;  %p3345_p9 = scmp.lt.u32.totalorder %s3341_s13, %s4206_s3 }
  0x1b   :  { %p3347_p10 = pnand %p3345_p9, %p3342_p8 }
  0x1d   :  { %3350 = shalt.err (!%p3347_p10)
}
  0x1e   :  { %s3351_s1 = scalar_lea.vmem %s64_s28, 8192  ;;  %p3356_p12 = scmp.lt.s32.totalorder %s64_s28, %s64_s28 }
  0x1f   :  { %p3352_p11 = scmp.ne.s32.totalorder %s64_s28, %s3351_s1  ;;  %p3357_p13 = scmp.lt.s32.totalorder %s3351_s1, %s3351_s1 }
  0x21   :  { %p3358_p0 = por %p3357_p13, %p3356_p12 }
  0x23   :  { %p3359_p1 = pnand %p3358_p0, %p3352_p11 }
  0x25   :  { %3362 = shalt.err (!%p3359_p1)
}
  0x26   :  { %s3512_s14 = smov 512   ;;  %s3513_s19 = smov 32  }
  0x27   :  { %69 = dma.hbm_to_vmem [thread:$0]  %s4206_s3, 8192, %s64_s28, [#allocation9], %s3512_s14, %s3512_s14, %s3513_s19  }
  0x28   :  { %s3363_s24 = scalar_lea.hbm %s4203_s0, 1024 }
  0x29   :  { %p3364_p2 = scmp.ne.s32.totalorder %s4203_s0, %s3363_s24  ;;  %p3367_p3 = scmp.lt.u32.totalorder %s3363_s24, %s4203_s0 }
  0x2b   :  { %p3369_p4 = pnand %p3367_p3, %p3364_p2 }
  0x2d   :  { %3372 = shalt.err (!%p3369_p4)
}
  0x2e   :  { %s3373_s11 = scalar_lea.vmem %s28_s30, 1024  ;;  %p3378_p6 = scmp.lt.s32.totalorder %s28_s30, %s28_s30 }
  0x2f   :  { %p3374_p5 = scmp.ne.s32.totalorder %s28_s30, %s3373_s11  ;;  %p3379_p7 = scmp.lt.s32.totalorder %s3373_s11, %s3373_s11 }
  0x31   :  { %p3380_p8 = por %p3379_p7, %p3378_p6 }
  0x33   :  { %p3381_p9 = pnand %p3380_p8, %p3374_p5 }
  0x35   :  { %3384 = shalt.err (!%p3381_p9)
}
  0x36   :  { %s3514_s3 = smov 128   ;;  %s3515_s28 = smov 8  }
  0x37   :  { %33 = dma.hbm_to_vmem [thread:$0]  %s4203_s0, 1024, %s28_s30, [#allocation3], %s3514_s3, %s3514_s3, %s3515_s28  }
  0x38   :  { %s3516_s15 = smov [#allocation7]   ;;  %s3517_s17 = smov [#allocation10]  }
  0x39   :  { %s51_s16 = sshll.u32 %s3516_s15, 4  ;;  %s77_s18 = sshll.u32 %s3517_s17, 4  ;;  %s52_s16 = int_to_ptr.vmem [resolvable:$true] %s51_s16  ;;  %s78_s18 = int_to_ptr.vmem [resolvable:$true] %s77_s18 }
  0x3a   :  { %s3385_s21 = scalar_lea.hbm %s4205_s2, 8192 }
  0x3b   :  { %p3386_p10 = scmp.ne.s32.totalorder %s4205_s2, %s3385_s21  ;;  %p3389_p11 = scmp.lt.u32.totalorder %s3385_s21, %s4205_s2 }
  0x3d   :  { %p3391_p12 = pnand %p3389_p11, %p3386_p10 }
  0x3f   :  { %3394 = shalt.err (!%p3391_p12)
}
  0x40   :  { %s3395_s0 = scalar_lea.vmem %s52_s16, 8192  ;;  %p3400_p0 = scmp.lt.s32.totalorder %s52_s16, %s52_s16 }
  0x41   :  { %p3396_p13 = scmp.ne.s32.totalorder %s52_s16, %s3395_s0  ;;  %p3401_p1 = scmp.lt.s32.totalorder %s3395_s0, %s3395_s0 }
  0x43   :  { %p3402_p2 = por %p3401_p1, %p3400_p0 }
  0x45   :  { %p3403_p3 = pnand %p3402_p2, %p3396_p13 }
  0x47   :  { %3406 = shalt.err (!%p3403_p3)
}
  0x48   :  { %57 = dma.hbm_to_vmem [thread:$0]  %s4205_s2, 8192, %s52_s16, [#allocation6], %s3512_s14, %s3512_s14, %s3513_s19  }
  0x49   :  { %s3407_s11 = scalar_lea.hbm %s4208_s5, 2048 }
  0x4a   :  { %p3408_p4 = scmp.ne.s32.totalorder %s4208_s5, %s3407_s11  ;;  %p3411_p5 = scmp.lt.u32.totalorder %s3407_s11, %s4208_s5 }
  0x4c   :  { %p3413_p6 = pnand %p3411_p5, %p3408_p4 }
  0x4e   :  { %3416 = shalt.err (!%p3413_p6)
}
  0x4f   :  { %s3417_s1 = scalar_lea.vmem %s78_s18, 2048  ;;  %p3422_p8 = scmp.lt.s32.totalorder %s78_s18, %s78_s18 }
  0x50   :  { %p3418_p7 = scmp.ne.s32.totalorder %s78_s18, %s3417_s1  ;;  %p3423_p9 = scmp.lt.s32.totalorder %s3417_s1, %s3417_s1 }
  0x52   :  { %p3424_p10 = por %p3423_p9, %p3422_p8 }
  0x54   :  { %p3425_p11 = pnand %p3424_p10, %p3418_p7 }
  0x56   :  { %3428 = shalt.err (!%p3425_p11)
}
  0x57   :  { %83 = dma.hbm_to_vmem [thread:$0]  %s4208_s5, 2048, %s78_s18, [#allocation9], %s3514_s3, %s3514_s3, %s3515_s28  }
  0x58   :  { %s3518_s19 = smov [#allocation11]   ;;  %s3429_s22 = scalar_lea.hbm %s4210_s7, 2048 }
  0x59   :  { %s91_s16 = sshll.u32 %s3518_s19, 4  ;;  %p3430_p12 = scmp.ne.s32.totalorder %s4210_s7, %s3429_s22  ;;  %s92_s16 = int_to_ptr.vmem [resolvable:$true] %s91_s16 }
  0x5a   :  { %p3433_p13 = scmp.lt.u32.totalorder %s3429_s22, %s4210_s7 }
  0x5c   :  { %p3435_p0 = pnand %p3433_p13, %p3430_p12 }
  0x5e   :  { %3438 = shalt.err (!%p3435_p0)
}
  0x5f   :  { %s3439_s30 = scalar_lea.vmem %s92_s16, 2048  ;;  %p3444_p2 = scmp.lt.s32.totalorder %s92_s16, %s92_s16 }
  0x60   :  { %p3440_p1 = scmp.ne.s32.totalorder %s92_s16, %s3439_s30  ;;  %p3445_p3 = scmp.lt.s32.totalorder %s3439_s30, %s3439_s30 }
  0x62   :  { %p3446_p4 = por %p3445_p3, %p3444_p2 }
  0x64   :  { %p3447_p5 = pnand %p3446_p4, %p3440_p1 }
  0x66   :  { %3450 = shalt.err (!%p3447_p5)
}
  0x67   :  { %97 = dma.hbm_to_vmem [thread:$0]  %s4210_s7, 2048, %s92_s16, [#allocation12], %s3514_s3, %s3514_s3, %s3515_s28  }
  0x68   :  { %3495 = dma.done.wait [#allocation3], 1024  }
  0x69   :  { %3496 = vsyncadd [#allocation3], 4294966272 }
  0x6a   :  { %3497 = dma.done.wait [#allocation6], 12288  }
  0x6b   :  { %3498 = vsyncadd [#allocation6], 4294955008 }
  0x6c   :  { %3499 = dma.done.wait [#allocation9], 10240  }
  0x6d   :  { %3500 = vsyncadd [#allocation9], 4294957056 }
  0x6e   :  { %3501 = dma.done.wait [#allocation12], 2048  }
  0x6f   :  { %3502 = vsyncadd [#allocation12], 4294965248  ;;  %v3519_v0 = vmov 0.0   ;;  %v127_v1 = vld [vmem:[#allocation5 + $0x8] sm:$0xff]  ;;  %v129_v2 = vld [vmem:[#allocation5 + $0x18] sm:$0xff]  ;;  %s3522_s26 = smov [#allocation14]  }
  0x70   :  { %222 = vmatprep.mubr.f32.mxu0 %v3519_v0  ;;  %501 = vmatprep.mubr.f32.mxu1 %v3519_v0  ;;  %v126_v3 = vld [vmem:[#allocation5] sm:$0xff]  ;;  %v2438_v4 = vpack.c.bf16 %v129_v2, %v127_v1  ;;  %v128_v5 = vld [vmem:[#allocation5 + $0x10] sm:$0xff]  ;;  %v131_v6 = vld [vmem:[#allocation5 + $0x28] sm:$0xff]  ;;  %s2292_s27 = sshll.u32 %s3522_s26, 4  ;;  %s2293_s27 = int_to_ptr.vmem [resolvable:$true] %s2292_s27 }
  0x71   :  { %v133_v7 = vld [vmem:[#allocation5 + $0x38] sm:$0xff]  ;;  %v2440_v8 = vpack.c.bf16 %v128_v5, %v126_v3  ;;  %v130_v10 = vld [vmem:[#allocation5 + $0x20] sm:$0xff]  ;;  %v132_v11 = vld [vmem:[#allocation5 + $0x30] sm:$0xff]  ;;  %s3451_s29 = scalar_lea.vmem %s2293_s27, 128  ;;  %p3456_p7 = scmp.lt.s32.totalorder %s2293_s27, %s2293_s27 }
  0x72   :  { %v2442_v9 = vpack.c.bf16 %v133_v7, %v131_v6  ;;  %v135_v12 = vld [vmem:[#allocation5 + $0x48] sm:$0xff]  ;;  %2439 = vmatprep.subr.bf16.mxu0 %v2438_v4  ;;  %v137_v13 = vld [vmem:[#allocation5 + $0x58] sm:$0xff]  ;;  %v2444_v14 = vpack.c.bf16 %v132_v11, %v130_v10  ;;  %v134_v16 = vld [vmem:[#allocation5 + $0x40] sm:$0xff]  ;;  %p3452_p6 = scmp.ne.s32.totalorder %s2293_s27, %s3451_s29  ;;  %p3457_p8 = scmp.lt.s32.totalorder %s3451_s29, %s3451_s29 }
  0x73   :  { %2441 = vmatpush1.bf16.msra.mxu0 %v2440_v8  ;;  %v2446_v15 = vpack.c.bf16 %v137_v13, %v135_v12  ;;  %v136_v17 = vld [vmem:[#allocation5 + $0x50] sm:$0xff]  ;;  %v139_v18 = vld [vmem:[#allocation5 + $0x68] sm:$0xff]  ;;  %v141_v19 = vld [vmem:[#allocation5 + $0x78] sm:$0xff] }
  0x74   :  { %2443 = vmatprep.subr.bf16.mxu0 %v2442_v9  ;;  %v2448_v20 = vpack.c.bf16 %v136_v17, %v134_v16  ;;  %v2450_v21 = vpack.c.bf16 %v141_v19, %v139_v18  ;;  %v138_v22 = vld [vmem:[#allocation5 + $0x60] sm:$0xff]  ;;  %v140_v23 = vld [vmem:[#allocation5 + $0x70] sm:$0xff]  ;;  %v143_v24 = vld [vmem:[#allocation5 + $0x88] sm:$0xff]  ;;  %p3458_p9 = por %p3457_p8, %p3456_p7 }
  0x75   :  { %v145_v25 = vld [vmem:[#allocation5 + $0x98] sm:$0xff]  ;;  %v2452_v26 = vpack.c.bf16 %v140_v23, %v138_v22  ;;  %v142_v27 = vld [vmem:[#allocation5 + $0x80] sm:$0xff]  ;;  %v144_v28 = vld [vmem:[#allocation5 + $0x90] sm:$0xff] }
  0x76   :  { %v2454_v29 = vpack.c.bf16 %v145_v25, %v143_v24  ;;  %v147_v30 = vld [vmem:[#allocation5 + $0xa8] sm:$0xff]  ;;  %v149_v33 = vld [vmem:[#allocation5 + $0xb8] sm:$0xff]  ;;  %v351_v35 = vld [vmem:[#allocation7] sm:$0xff]  ;;  %v2456_v38 = vpack.c.bf16 %v144_v28, %v142_v27  ;;  %p3459_p10 = pnand %p3458_p9, %p3452_p6 }
  0x77   :  { %2445 = vmatpush1.bf16.msra.mxu0 %v2444_v14  ;;  %v352_v31 = vld [vmem:[#allocation7 + $0x8] sm:$0xff]  ;;  %v355_v36 = vld [vmem:[#allocation7 + $0x20] sm:$0xff]  ;;  %v2458_v42 = vpack.c.bf16 %v149_v33, %v147_v30  ;;  %v148_v44 = vld [vmem:[#allocation5 + $0xb0] sm:$0xff] }
  0x78   :  { %2447 = vmatprep.subr.bf16.mxu0 %v2446_v15  ;;  %v356_v32 = vld [vmem:[#allocation7 + $0x28] sm:$0xff]  ;;  %v2472_v37 = vpack.c.bf16 %v355_v36, %v351_v35  ;;  %v359_v41 = vld [vmem:[#allocation7 + $0x40] sm:$0xff]  ;;  %v153_v48 = vld [vmem:[#allocation5 + $0xd8] sm:$0xff] }
  0x79   :  { %v2470_v34 = vpack.c.bf16 %v356_v32, %v352_v31  ;;  %v360_v39 = vld [vmem:[#allocation7 + $0x48] sm:$0xff]  ;;  %v146_v43 = vld [vmem:[#allocation5 + $0xa0] sm:$0xff]  ;;  %v152_v58 = vld [vmem:[#allocation5 + $0xd0] sm:$0xff] }
  0x7a   :  { %v364_v40 = vld [vmem:[#allocation7 + $0x68] sm:$0xff]  ;;  %v363_v46 = vld [vmem:[#allocation7 + $0x60] sm:$0xff]  ;;  %v2460_v54 = vpack.c.bf16 %v148_v44, %v146_v43  ;;  %v157_v61 = vld [vmem:[#allocation5 + $0xf8] sm:$0xff] }
  0x7b   :  { %2449 = vmatpush1.bf16.msra.mxu0 %v2448_v20  ;;  %2471 = vmatprep.subr.bf16.mxu1 %v2470_v34  ;;  %v2474_v45 = vpack.c.bf16 %v364_v40, %v360_v39  ;;  %v151_v47 = vld [vmem:[#allocation5 + $0xc8] sm:$0xff]  ;;  %v2476_v49 = vpack.c.bf16 %v363_v46, %v359_v41  ;;  %v367_v52 = vld [vmem:[#allocation7 + $0x80] sm:$0xff]  ;;  %v156_v2 = vld [vmem:[#allocation5 + $0xf0] sm:$0xff] }
  0x7c   :  { %2451 = vmatprep.subr.bf16.mxu0 %v2450_v21  ;;  %2473 = vmatpush1.bf16.msra.mxu1 %v2472_v37  ;;  %v368_v50 = vld [vmem:[#allocation7 + $0x88] sm:$0xff]  ;;  %v371_v53 = vld [vmem:[#allocation7 + $0xa0] sm:$0xff]  ;;  %v2462_v56 = vpack.c.bf16 %v153_v48, %v151_v47  ;;  %v354_v3 = vld [vmem:[#allocation7 + $0x18] sm:$0xff] }
  0x7d   :  { %2475 = vmatprep.subr.bf16.mxu1 %v2474_v45  ;;  %v372_v51 = vld [vmem:[#allocation7 + $0xa8] sm:$0xff]  ;;  %v150_v57 = vld [vmem:[#allocation5 + $0xc0] sm:$0xff]  ;;  %v2480_v59 = vpack.c.bf16 %v371_v53, %v367_v52  ;;  %v358_v4 = vld [vmem:[#allocation7 + $0x38] sm:$0xff] }
  0x7e   :  { %v2478_v55 = vpack.c.bf16 %v372_v51, %v368_v50  ;;  %v155_v60 = vld [vmem:[#allocation5 + $0xe8] sm:$0xff]  ;;  %v2464_v62 = vpack.c.bf16 %v152_v58, %v150_v57  ;;  %v154_v1 = vld [vmem:[#allocation5 + $0xe0] sm:$0xff]  ;;  %v2502_v6 = vpack.c.bf16 %v358_v4, %v354_v3  ;;  %v353_v7 = vld [vmem:[#allocation7 + $0x10] sm:$0xff] }
  0x7f   :  { %2453 = vmatpush1.bf16.msra.mxu0 %v2452_v26  ;;  %v2466_v63 = vpack.c.bf16 %v157_v61, %v155_v60  ;;  %v2468_v5 = vpack.c.bf16 %v156_v2, %v154_v1  ;;  %v357_v8 = vld [vmem:[#allocation7 + $0x30] sm:$0xff]  ;;  %v362_v9 = vld [vmem:[#allocation7 + $0x58] sm:$0xff]  ;;  %v118_v11 = vld [vmem:[#allocation2] sm:$0xff] }
  0x80   :  { %2455 = vmatprep.subr.bf16.mxu0 %v2454_v29  ;;  %2477 = vmatpush1.bf16.msra.mxu1 %v2476_v49  ;;  %v366_v10 = vld [vmem:[#allocation7 + $0x78] sm:$0xff]  ;;  %v2504_v12 = vpack.c.bf16 %v357_v8, %v353_v7  ;;  %v361_v14 = vld [vmem:[#allocation7 + $0x50] sm:$0xff]  ;;  %v119_v18 = vld [vmem:[#allocation2 + $0x8] sm:$0xff] }
  0x81   :  { %2479 = vmatprep.subr.bf16.mxu1 %v2478_v55  ;;  %v2506_v13 = vpack.c.bf16 %v366_v10, %v362_v9  ;;  %v365_v15 = vld [vmem:[#allocation7 + $0x70] sm:$0xff]  ;;  %v370_v16 = vld [vmem:[#allocation7 + $0x98] sm:$0xff]  ;;  %v122_v26 = vld [vmem:[#allocation2 + $0x20] sm:$0xff] }
  0x82   :  { %v374_v17 = vld [vmem:[#allocation7 + $0xb8] sm:$0xff]  ;;  %v2508_v19 = vpack.c.bf16 %v365_v15, %v361_v14  ;;  %v369_v21 = vld [vmem:[#allocation7 + $0x90] sm:$0xff]  ;;  %v123_v27 = vld [vmem:[#allocation2 + $0x28] sm:$0xff] }
  0x83   :  { %2457 = vmatpush1.bf16.msra.mxu0 %v2456_v38  ;;  %v2510_v20 = vpack.c.bf16 %v374_v17, %v370_v16  ;;  %v373_v22 = vld [vmem:[#allocation7 + $0xb0] sm:$0xff]  ;;  %v121_v25 = vld [vmem:[#allocation2 + $0x18] sm:$0xff]  ;;  %v376_v30 = vld [vmem:[#allocation7 + $0xc8] sm:$0xff] }
  0x84   :  { %2459 = vmatprep.subr.bf16.mxu0 %v2458_v42  ;;  %2481 = vmatpush1.bf16.msra.mxu1 %v2480_v59  ;;  %v120_v23 = vld [vmem:[#allocation2 + $0x10] sm:$0xff]  ;;  %v2512_v24 = vpack.c.bf16 %v373_v22, %v369_v21  ;;  %v125_v29 = vld [vmem:[#allocation2 + $0x38] sm:$0xff]  ;;  %v380_v31 = vld [vmem:[#allocation7 + $0xe8] sm:$0xff] }
  0x85   :  { %v124_v28 = vld [vmem:[#allocation2 + $0x30] sm:$0xff]  ;;  %v378_v32 = vld [vmem:[#allocation7 + $0xd8] sm:$0xff]  ;;  %v2482_v33 = vpack.c.bf16 %v380_v31, %v376_v30  ;;  %v375_v34 = vld [vmem:[#allocation7 + $0xc0] sm:$0xff] }
  0x86   :  { %v379_v35 = vld [vmem:[#allocation7 + $0xe0] sm:$0xff]  ;;  %v382_v36 = vld [vmem:[#allocation7 + $0xf8] sm:$0xff]  ;;  %v377_v39 = vld [vmem:[#allocation7 + $0xd0] sm:$0xff] }
  0x87   :  { %2461 = vmatpush1.bf16.msra.mxu0 %v2460_v54  ;;  %v2484_v37 = vpack.c.bf16 %v379_v35, %v375_v34  ;;  %v2514_v38 = vpack.c.bf16 %v382_v36, %v378_v32  ;;  %v381_v40 = vld [vmem:[#allocation7 + $0xf0] sm:$0xff]  ;;  %2483 = vmatprep.subr.bf16.mxu1 %v2482_v33  ;;  %v384_v42 = vld [vmem:[#allocation7 + $0x108] sm:$0xff]  ;;  %v386_v44 = vld [vmem:[#allocation7 + $0x118] sm:$0xff] }
  0x88   :  { %2463 = vmatprep.subr.bf16.mxu0 %v2462_v56  ;;  %v2516_v41 = vpack.c.bf16 %v381_v40, %v377_v39  ;;  %v388_v43 = vld [vmem:[#allocation7 + $0x128] sm:$0xff]  ;;  %v383_v46 = vld [vmem:[#allocation7 + $0x100] sm:$0xff]  ;;  %v390_v48 = vld [vmem:[#allocation7 + $0x138] sm:$0xff] }
  0x89   :  { %2485 = vmatpush1.bf16.msra.mxu1 %v2484_v37  ;;  %v2486_v45 = vpack.c.bf16 %v388_v43, %v384_v42  ;;  %v387_v47 = vld [vmem:[#allocation7 + $0x120] sm:$0xff]  ;;  %v2518_v50 = vpack.c.bf16 %v390_v48, %v386_v44  ;;  %v385_v51 = vld [vmem:[#allocation7 + $0x110] sm:$0xff]  ;;  %v392_v54 = vld [vmem:[#allocation7 + $0x148] sm:$0xff] }
  0x8a   :  { %v2488_v49 = vpack.c.bf16 %v387_v47, %v383_v46  ;;  %v389_v52 = vld [vmem:[#allocation7 + $0x130] sm:$0xff]  ;;  %v396_v55 = vld [vmem:[#allocation7 + $0x168] sm:$0xff]  ;;  %v394_v56 = vld [vmem:[#allocation7 + $0x158] sm:$0xff] }
  0x8b   :  { %2465 = vmatpush1.bf16.msra.mxu0 %v2464_v62  ;;  %2487 = vmatprep.subr.bf16.mxu1 %v2486_v45  ;;  %v2520_v53 = vpack.c.bf16 %v389_v52, %v385_v51  ;;  %v2490_v57 = vpack.c.bf16 %v396_v55, %v392_v54  ;;  %v391_v58 = vld [vmem:[#allocation7 + $0x140] sm:$0xff]  ;;  %v398_v60 = vld [vmem:[#allocation7 + $0x178] sm:$0xff]  ;;  %v397_v1 = vld [vmem:[#allocation7 + $0x170] sm:$0xff] }
  0x8c   :  { %2467 = vmatprep.subr.bf16.mxu0 %v2466_v63  ;;  %v395_v59 = vld [vmem:[#allocation7 + $0x160] sm:$0xff]  ;;  %v2522_v62 = vpack.c.bf16 %v398_v60, %v394_v56  ;;  %v393_v63 = vld [vmem:[#allocation7 + $0x150] sm:$0xff]  ;;  %v400_v3 = vld [vmem:[#allocation7 + $0x188] sm:$0xff] }
  0x8d   :  { %2489 = vmatpush1.bf16.msra.mxu1 %v2488_v49  ;;  %v2492_v61 = vpack.c.bf16 %v395_v59, %v391_v58  ;;  %v2524_v2 = vpack.c.bf16 %v397_v1, %v393_v63  ;;  %v404_v4 = vld [vmem:[#allocation7 + $0x1a8] sm:$0xff]  ;;  %v399_v7 = vld [vmem:[#allocation7 + $0x180] sm:$0xff]  ;;  %v406_v9 = vld [vmem:[#allocation7 + $0x1b8] sm:$0xff] }
  0x8e   :  { %2491 = vmatprep.subr.bf16.mxu1 %v2490_v57  ;;  %v403_v8 = vld [vmem:[#allocation7 + $0x1a0] sm:$0xff]  ;;  %v408_v15 = vld [vmem:[#allocation7 + $0x1c8] sm:$0xff]  ;;  %v410_v17 = vld [vmem:[#allocation7 + $0x1d8] sm:$0xff] }
  0x8f   :  { %2469 = vmatpush1.bf16.msra.mxu0 %v2468_v5  ;;  %v402_v5 = vld [vmem:[#allocation7 + $0x198] sm:$0xff]  ;;  %v2496_v10 = vpack.c.bf16 %v403_v8, %v399_v7  ;;  %v412_v16 = vld [vmem:[#allocation7 + $0x1e8] sm:$0xff]  ;;  %v663_v51 = vld [vmem:[#allocation8] sm:$0xff] }
  0x90   :  { %2503 = vmatprep.subr.bf16.mxu0 %v2502_v6  ;;  %v2494_v6 = vpack.c.bf16 %v404_v4, %v400_v3  ;;  %v414_v21 = vld [vmem:[#allocation7 + $0x1f8] sm:$0xff]  ;;  %v665_v54 = vld [vmem:[#allocation8 + $0x10] sm:$0xff]  ;;  %v672_v59 = vld [vmem:[#allocation8 + $0x48] sm:$0xff] }
  0x91   :  { %2493 = vmatpush1.bf16.msra.mxu1 %v2492_v61  ;;  %v666_v30 = vld [vmem:[#allocation8 + $0x18] sm:$0xff]  ;;  %v669_v55 = vld [vmem:[#allocation8 + $0x30] sm:$0xff]  ;;  %v676_v60 = vld [vmem:[#allocation8 + $0x68] sm:$0xff] }
  0x92   :  { %223 = vmatmul.mubr.f32.vlgmr.msra.gmra.mrb[0].mxu0 %v118_v11  ;;  %v2526_v11 = vpack.c.bf16 %v406_v9, %v402_v5  ;;  %2495 = vmatprep.subr.bf16.mxu1 %v2494_v6  ;;  %v670_v31 = vld [vmem:[#allocation8 + $0x38] sm:$0xff]  ;;  %v3692_v3 = vpack.c.bf16 %v669_v55, %v665_v54  ;;  %v671_v4 = vld [vmem:[#allocation8 + $0x40] sm:$0xff]  ;;  %v673_v9 = vld [vmem:[#allocation8 + $0x50] sm:$0xff] }
  0x93   :  { %228 = vmatprep.mubr.f32.mxu0 %v3519_v0  ;;  %2505 = vmatpush1.bf16.msra.mxu0 %v2504_v12  ;;  %v401_v12 = vld [vmem:[#allocation7 + $0x190] sm:$0xff]  ;;  %v3678_v32 = vpack.c.bf16 %v670_v31, %v666_v30  ;;  %v674_v61 = vld [vmem:[#allocation8 + $0x58] sm:$0xff]  ;;  %v675_v5 = vld [vmem:[#allocation8 + $0x60] sm:$0xff] }
  0x94   :  { %2507 = vmatprep.subr.bf16.mxu0 %v2506_v13  ;;  %v405_v13 = vld [vmem:[#allocation7 + $0x1b0] sm:$0xff]  ;;  %v678_v6 = vld [vmem:[#allocation8 + $0x78] sm:$0xff] }
  0x95   :  { %v2528_v14 = vpack.c.bf16 %v405_v13, %v401_v12  ;;  %2497 = vmatpush1.bf16.msra.mxu1 %v2496_v10  ;;  %v677_v10 = vld [vmem:[#allocation8 + $0x70] sm:$0xff]  ;;  %v3695_v12 = vpack.c.bf16 %v676_v60, %v672_v59  ;;  %v680_v13 = vld [vmem:[#allocation8 + $0x88] sm:$0xff] }
  0x96   :  { %229 = vmatmul.mubr.f32.gmra.mrb[2].mxu0 %v119_v18  ;;  %v2498_v18 = vpack.c.bf16 %v412_v16, %v408_v15 }
  0x97   :  { %234 = vmatprep.mubr.f32.mxu0 %v3519_v0  ;;  %2509 = vmatpush1.bf16.msra.mxu0 %v2508_v19  ;;  %v407_v19 = vld [vmem:[#allocation7 + $0x1c0] sm:$0xff] }
  0x98   :  { %2511 = vmatprep.subr.bf16.mxu0 %v2510_v20  ;;  %v411_v20 = vld [vmem:[#allocation7 + $0x1e0] sm:$0xff]  ;;  %2499 = vmatprep.subr.bf16.mxu1 %v2498_v18  ;;  %v3699_v18 = vpack.c.bf16 %v675_v5, %v671_v4 }
  0x99   :  { %v2500_v22 = vpack.c.bf16 %v411_v20, %v407_v19  ;;  %v3701_v19 = vpack.c.bf16 %v678_v6, %v674_v61  ;;  %v684_v20 = vld [vmem:[#allocation8 + $0xa8] sm:$0xff] }
  0x9a   :  { %235 = vmatmul.mubr.f32.gmra.mrb[4].mxu0 %v120_v23  ;;  %v2530_v23 = vpack.c.bf16 %v414_v21, %v410_v17  ;;  %v679_v21 = vld [vmem:[#allocation8 + $0x80] sm:$0xff]  ;;  %v696_v6 = vld [vmem:[#allocation8 + $0x108] sm:$0xff] }
  0x9b   :  { %240 = vmatprep.mubr.f32.mxu0 %v3519_v0  ;;  %2513 = vmatpush1.bf16.msra.mxu0 %v2512_v24  ;;  %v409_v24 = vld [vmem:[#allocation7 + $0x1d0] sm:$0xff] }
  0x9c   :  { %2515 = vmatprep.subr.bf16.mxu0 %v2514_v38  ;;  %2501 = vmatpush1.bf16.msra.mxu1 %v2500_v22  ;;  %v683_v22 = vld [vmem:[#allocation8 + $0xa0] sm:$0xff] }
  0x9e   :  { %241 = vmatmul.mubr.f32.gmra.mrb[6].mxu0 %v121_v25  ;;  %v413_v25 = vld [vmem:[#allocation7 + $0x1f0] sm:$0xff] }
  0x9f   :  { %246 = vmatprep.mubr.f32.mxu0 %v3519_v0  ;;  %2517 = vmatpush1.bf16.msra.mxu0 %v2516_v41 }
  0xa0   :  { %2519 = vmatprep.subr.bf16.mxu0 %v2518_v50 }
  0xa2   :  { %247 = vmatmul.mubr.f32.gmra.mrb[8].mxu0 %v122_v26  ;;  %v2532_v26 = vpack.c.bf16 %v413_v25, %v409_v24 }
  0xa3   :  { %252 = vmatprep.mubr.f32.mxu0 %v3519_v0  ;;  %2521 = vmatpush1.bf16.msra.mxu0 %v2520_v53  ;;  %v667_v53 = vld [vmem:[#allocation8 + $0x20] sm:$0xff] }
  0xa4   :  { %2523 = vmatprep.subr.bf16.mxu0 %v2522_v62 }
  0xa6   :  { %253 = vmatmul.mubr.f32.gmra.mrb[10].mxu0 %v123_v27  ;;  %v664_v27 = vld [vmem:[#allocation8 + $0x8] sm:$0xff] }
  0xa7   :  { %258 = vmatprep.mubr.f32.mxu0 %v3519_v0  ;;  %2525 = vmatpush1.bf16.msra.mxu0 %v2524_v2  ;;  %v3690_v2 = vpack.c.bf16 %v667_v53, %v663_v51  ;;  %v694_v53 = vld [vmem:[#allocation8 + $0xf8] sm:$0xff] }
  0xa8   :  { %2527 = vmatprep.subr.bf16.mxu0 %v2526_v11 }
  0xaa   :  { %259 = vmatmul.mubr.f32.gmra.mrb[12].mxu0 %v124_v28  ;;  %v668_v28 = vld [vmem:[#allocation8 + $0x28] sm:$0xff] }
  0xab   :  { %264 = vmatprep.mubr.f32.mxu0 %v3519_v0  ;;  %2529 = vmatpush1.bf16.msra.mxu0 %v2528_v14 }
  0xac   :  { %2531 = vmatprep.subr.bf16.mxu0 %v2530_v23 }
  0xae   :  { %265 = vmatmul.mubr.f32.gmra.mrb[14].mxu0 %v125_v29  ;;  %v3676_v29 = vpack.c.bf16 %v668_v28, %v664_v27  ;;  %v682_v27 = vld [vmem:[#allocation8 + $0x98] sm:$0xff] }
  0xaf   :  { %614 = vmatprep.mubr.f32.mxu0 %v3519_v0  ;;  %2533 = vmatpush1.bf16.msra.mxu0 %v2532_v26  ;;  %v3704_v26 = vpack.c.bf16 %v677_v10, %v673_v9  ;;  %v686_v28 = vld [vmem:[#allocation8 + $0xb8] sm:$0xff] }
  0xb0   :  { %2535 = vmatprep.subr.bf16.mxu1 %v3676_v29  ;;  %2567 = vmatprep.subr.bf16.mxu0 %v3678_v32 }
 0x165   :  { %v224_v33 = vpop.f32.mrb[0].mxu0 }
 0x166   :  { %v271_v34 = vmul.f32 %v224_v33, %v224_v33  ;;  %v226_v35 = vpop.f32.mrb[1].mxu0  ;;  %v681_v33 = vld [vmem:[#allocation8 + $0x90] sm:$0xff] }
 0x167   :  { %v279_v36 = vmul.f32 %v226_v35, %v226_v35 }
 0x169   :  { %v287_v37 = vadd.f32 %v279_v36, %v271_v34  ;;  %v230_v38 = vpop.f32.mrb[2].mxu0  ;;  %v685_v34 = vld [vmem:[#allocation8 + $0xb0] sm:$0xff]  ;;  %v3715_v36 = vpack.c.bf16 %v684_v20, %v680_v13  ;;  %v702_v13 = vld [vmem:[#allocation8 + $0x138] sm:$0xff]  ;;  %v699_v20 = vld [vmem:[#allocation8 + $0x120] sm:$0xff] }
 0x16a   :  { %v272_v39 = vmul.f32 %v230_v38, %v230_v38  ;;  %v232_v40 = vpop.f32.mrb[3].mxu0  ;;  %v688_v38 = vld [vmem:[#allocation8 + $0xc8] sm:$0xff]  ;;  %v3726_v51 = vpack.c.bf16 %v685_v34, %v681_v33 }
 0x16b   :  { %v280_v41 = vmul.f32 %v232_v40, %v232_v40  ;;  %3175 = vrsqrt.f32 %v287_v37  ;;  %vm297_vm0 = vcmp.eq.f32.partialorder %v287_v37, inf  ;;  %v300_v8 = vand.u32 2147483648, %v287_v37  ;;  %v708_v34 = vld [vmem:[#allocation8 + $0x168] sm:$0xff] }
 0x16c   :  { %vm299_vm1 = vcmp.eq.f32.partialorder %v287_v37, 0.0 }
 0x16d   :  { %v3682_v42 = vadd.f32 %v280_v41, %v272_v39  ;;  %v236_v43 = vpop.f32.mrb[4].mxu0 }
 0x16e   :  { %v273_v44 = vmul.f32 %v236_v43, %v236_v43  ;;  %v238_v45 = vpop.f32.mrb[5].mxu0 }
 0x16f   :  { %v281_v46 = vmul.f32 %v238_v45, %v238_v45  ;;  %3177 = vrsqrt.f32 %v3682_v42  ;;  %vm304_vm2 = vcmp.eq.f32.partialorder %v3682_v42, inf  ;;  %v307_v31 = vand.u32 2147483648, %v3682_v42  ;;  %v692_v45 = vld [vmem:[#allocation8 + $0xe8] sm:$0xff] }
 0x170   :  { %vm306_vm3 = vcmp.eq.f32.partialorder %v3682_v42, 0.0  ;;  %v3737_v60 = vpack.c.bf16 %v692_v45, %v688_v38  ;;  %v710_v38 = vld [vmem:[#allocation8 + $0x178] sm:$0xff] }
 0x171   :  { %v3685_v47 = vadd.f32 %v281_v46, %v273_v44  ;;  %v242_v48 = vpop.f32.mrb[6].mxu0  ;;  %v3723_v44 = vpack.c.bf16 %v686_v28, %v682_v27  ;;  %v687_v46 = vld [vmem:[#allocation8 + $0xc0] sm:$0xff] }
 0x172   :  { %v274_v49 = vmul.f32 %v242_v48, %v242_v48  ;;  %v244_v50 = vpop.f32.mrb[7].mxu0  ;;  %v691_v48 = vld [vmem:[#allocation8 + $0xe0] sm:$0xff] }
 0x173   :  { %v282_v52 = vmul.f32 %v244_v50, %v244_v50  ;;  %3179 = vrsqrt.f32 %v3685_v47  ;;  %vm311_vm4 = vcmp.eq.f32.partialorder %v3685_v47, inf  ;;  %v314_v55 = vand.u32 2147483648, %v3685_v47 }
 0x174   :  { %vm313_vm5 = vcmp.eq.f32.partialorder %v3685_v47, 0.0  ;;  %v3739_v61 = vpack.c.bf16 %v691_v48, %v687_v46  ;;  %v707_v46 = vld [vmem:[#allocation8 + $0x160] sm:$0xff]  ;;  %v705_v48 = vld [vmem:[#allocation8 + $0x150] sm:$0xff] }
 0x175   :  { %v3176_v56 = vpop.eup %3175  ;;  %v3688_v57 = vadd.f32 %v282_v52, %v274_v49  ;;  %v248_v58 = vpop.f32.mrb[8].mxu0  ;;  %v690_v52 = vld [vmem:[#allocation8 + $0xd8] sm:$0xff] }
 0x176   :  { %v275_v62 = vmul.f32 %v248_v58, %v248_v58  ;;  %v250_v63 = vpop.f32.mrb[9].mxu0  ;;  %v296_v1 = vmul.f32 %v3176_v56, %v287_v37  ;;  %v689_v56 = vld [vmem:[#allocation8 + $0xd0] sm:$0xff]  ;;  %v3745_v5 = vpack.c.bf16 %v694_v53, %v690_v52 }
 0x177   :  { %v283_v7 = vmul.f32 %v250_v63, %v250_v63  ;;  %3181 = vrsqrt.f32 %v3688_v57  ;;  %v693_v58 = vld [vmem:[#allocation8 + $0xf0] sm:$0xff]  ;;  %vm318_vm6 = vcmp.eq.f32.partialorder %v3688_v57, inf  ;;  %vm320_vm7 = vcmp.eq.f32.partialorder %v3688_v57, 0.0 }
 0x178   :  { %v298_v11 = vsel %vm297_vm0, %v287_v37, %v296_v1  ;;  %v3717_v37 = vpack.c.bf16 %v683_v22, %v679_v21  ;;  %v3748_v10 = vpack.c.bf16 %v693_v58, %v689_v56  ;;  %v716_v56 = vld [vmem:[#allocation8 + $0x1a8] sm:$0xff]  ;;  %v718_v58 = vld [vmem:[#allocation8 + $0x1b8] sm:$0xff]  ;;  %vm3521_vm0 = vmmov 0  }
 0x179   :  { %v3178_v14 = vpop.eup %3177  ;;  %v3697_v15 = vadd.f32 %v283_v7, %v275_v62  ;;  %v254_v16 = vpop.f32.mrb[10].mxu0  ;;  %v301_v17 = vsel %vm299_vm1, %v300_v8, %v298_v11  ;;  %v700_v7 = vld [vmem:[#allocation8 + $0x128] sm:$0xff]  ;;  %v698_v11 = vld [vmem:[#allocation8 + $0x118] sm:$0xff] }
 0x17a   :  { %v276_v23 = vmul.f32 %v254_v16, %v254_v16  ;;  %v256_v24 = vpop.f32.mrb[11].mxu0  ;;  %502 = vmatmul.mubr.f32.vlgmr.msra.gmra.mrb[0].mxu1 %v301_v17  ;;  %615 = vmatmul.mubr.f32.vlgmr.msra.gmra.mrb[16].mxu0 %v301_v17  ;;  %v303_v25 = vmul.f32 %v3178_v14, %v3682_v42  ;;  %v321_v16 = vand.u32 2147483648, %v3688_v57  ;;  %v695_v17 = vld [vmem:[#allocation8 + $0x100] sm:$0xff]  ;;  %v3759_v22 = vpack.c.bf16 %v700_v7, %v696_v6 }
 0x17b   :  { %v284_v30 = vmul.f32 %v256_v24, %v256_v24  ;;  %2537 = vmatpush1.bf16.msra.mxu1 %v3690_v2  ;;  %2569 = vmatpush1.bf16.msra.mxu0 %v3692_v3  ;;  %3183 = vrsqrt.f32 %v3697_v15  ;;  %v701_v24 = vld [vmem:[#allocation8 + $0x130] sm:$0xff]  ;;  %vm325_vm8 = vcmp.eq.f32.partialorder %v3697_v15, inf  ;;  %vm327_vm9 = vcmp.eq.f32.partialorder %v3697_v15, 0.0  ;;  %v715_v7 = vld [vmem:[#allocation8 + $0x1a0] sm:$0xff] }
 0x17c   :  { %507 = vmatprep.mubr.f32.mxu1 %v3519_v0  ;;  %620 = vmatprep.mubr.f32.mxu0 %v3519_v0  ;;  %v305_v35 = vsel %vm304_vm2, %v3682_v42, %v303_v25 }
 0x17d   :  { %v3180_v39 = vpop.eup %3179  ;;  %v3719_v40 = vadd.f32 %v284_v30, %v276_v23  ;;  %v260_v41 = vpop.f32.mrb[12].mxu0  ;;  %2539 = vmatprep.subr.bf16.mxu1 %v3695_v12  ;;  %v308_v43 = vsel %vm306_vm3, %v307_v31, %v305_v35  ;;  %2571 = vmatprep.subr.bf16.mxu0 %v3701_v19  ;;  %v697_v23 = vld [vmem:[#allocation8 + $0x110] sm:$0xff]  ;;  %v3765_v30 = vpack.c.bf16 %v702_v13, %v698_v11  ;;  %v704_v31 = vld [vmem:[#allocation8 + $0x148] sm:$0xff]  ;;  %v706_v35 = vld [vmem:[#allocation8 + $0x158] sm:$0xff] }
 0x17e   :  { %v277_v42 = vmul.f32 %v260_v41, %v260_v41  ;;  %v262_v49 = vpop.f32.mrb[13].mxu0  ;;  %508 = vmatmul.mubr.f32.gmra.mrb[2].mxu1 %v308_v43  ;;  %621 = vmatmul.mubr.f32.gmra.mrb[18].mxu0 %v308_v43  ;;  %v310_v50 = vmul.f32 %v3180_v39, %v3685_v47  ;;  %v328_v39 = vand.u32 2147483648, %v3697_v15  ;;  %v3774_v41 = vpack.c.bf16 %v701_v24, %v697_v23  ;;  %v703_v43 = vld [vmem:[#allocation8 + $0x140] sm:$0xff] }
 0x17f   :  { %v285_v54 = vmul.f32 %v262_v49, %v262_v49  ;;  %2541 = vmatpush1.bf16.msra.mxu1 %v3699_v18  ;;  %2573 = vmatpush1.bf16.msra.mxu0 %v3704_v26  ;;  %3185 = vrsqrt.f32 %v3719_v40  ;;  %v3783_v52 = vpack.c.bf16 %v708_v34, %v704_v31  ;;  %v3785_v53 = vpack.c.bf16 %v710_v38, %v706_v35  ;;  %v721_v34 = vld [vmem:[#allocation8 + $0x1d0] sm:$0xff] }
 0x180   :  { %513 = vmatprep.mubr.f32.mxu1 %v3519_v0  ;;  %626 = vmatprep.mubr.f32.mxu0 %v3519_v0  ;;  %v312_v59 = vsel %vm311_vm4, %v3685_v47, %v310_v50  ;;  %vm332_vm10 = vcmp.eq.f32.partialorder %v3719_v40, inf  ;;  %vm334_vm11 = vcmp.eq.f32.partialorder %v3719_v40, 0.0  ;;  %v725_v35 = vld [vmem:[#allocation8 + $0x1f0] sm:$0xff] }
 0x181   :  { %v3182_v62 = vpop.eup %3181  ;;  %v3741_v63 = vadd.f32 %v285_v54, %v277_v42  ;;  %v266_v1 = vpop.f32.mrb[14].mxu0  ;;  %2543 = vmatprep.subr.bf16.mxu1 %v3715_v36  ;;  %v315_v4 = vsel %vm313_vm5, %v314_v55, %v312_v59  ;;  %2575 = vmatprep.subr.bf16.mxu0 %v3723_v44  ;;  %v709_v42 = vld [vmem:[#allocation8 + $0x170] sm:$0xff]  ;;  %v712_v54 = vld [vmem:[#allocation8 + $0x188] sm:$0xff]  ;;  %v335_v59 = vand.u32 2147483648, %v3719_v40 }
 0x182   :  { %v278_v8 = vmul.f32 %v266_v1, %v266_v1  ;;  %v268_v9 = vpop.f32.mrb[15].mxu0  ;;  %514 = vmatmul.mubr.f32.gmra.mrb[4].mxu1 %v315_v4  ;;  %627 = vmatmul.mubr.f32.gmra.mrb[20].mxu0 %v315_v4  ;;  %v317_v47 = vmul.f32 %v3182_v62, %v3688_v57  ;;  %v3792_v62 = vpack.c.bf16 %v707_v46, %v703_v43  ;;  %v711_v4 = vld [vmem:[#allocation8 + $0x180] sm:$0xff] }
 0x183   :  { %v286_v14 = vmul.f32 %v268_v9, %v268_v9  ;;  %2545 = vmatpush1.bf16.msra.mxu1 %v3717_v37  ;;  %2577 = vmatpush1.bf16.msra.mxu0 %v3726_v51  ;;  %3187 = vrsqrt.f32 %v3741_v63  ;;  %v3794_v1 = vpack.c.bf16 %v709_v42, %v705_v48  ;;  %v717_v9 = vld [vmem:[#allocation8 + $0x1b0] sm:$0xff]  ;;  %v3802_v13 = vpack.c.bf16 %v716_v56, %v712_v54  ;;  %v415_v56 = vld [vmem:[%s4207_s4] sm:$0xf] }
 0x184   :  { %519 = vmatprep.mubr.f32.mxu1 %v3519_v0  ;;  %632 = vmatprep.mubr.f32.mxu0 %v3519_v0  ;;  %v319_v21 = vsel %vm318_vm6, %v3688_v57, %v317_v47  ;;  %v3768_v57 = vpack.c.bf16 %v699_v20, %v695_v17  ;;  %v724_v20 = vld [vmem:[#allocation8 + $0x1e8] sm:$0xff]  ;;  %vm339_vm12 = vcmp.eq.f32.partialorder %v3741_v63, inf  ;;  %v342_v23 = vand.u32 2147483648, %v3741_v63 }
 0x185   :  { %v3184_v25 = vpop.eup %3183  ;;  %v3761_v27 = vadd.f32 %v286_v14, %v278_v8  ;;  %2547 = vmatprep.subr.bf16.mxu1 %v3737_v60  ;;  %v322_v28 = vsel %vm320_vm7, %v321_v16, %v319_v21  ;;  %2579 = vmatprep.subr.bf16.mxu0 %v3745_v5  ;;  %v713_v8 = vld [vmem:[#allocation8 + $0x190] sm:$0xff]  ;;  %v720_v16 = vld [vmem:[#allocation8 + $0x1c8] sm:$0xff]  ;;  %v726_v21 = vld [vmem:[#allocation8 + $0x1f8] sm:$0xff]  ;;  %v3811_v24 = vpack.c.bf16 %v715_v7, %v711_v4  ;;  %vm341_vm13 = vcmp.eq.f32.partialorder %v3741_v63, 0.0 }
 0x186   :  { %520 = vmatmul.mubr.f32.gmra.mrb[6].mxu1 %v322_v28  ;;  %633 = vmatmul.mubr.f32.gmra.mrb[22].mxu0 %v322_v28  ;;  %v324_v33 = vmul.f32 %v3184_v25, %v3697_v15  ;;  %v3813_v25 = vpack.c.bf16 %v717_v9, %v713_v8  ;;  %v719_v28 = vld [vmem:[#allocation8 + $0x1c0] sm:$0xff]  ;;  %v3821_v43 = vpack.c.bf16 %v724_v20, %v720_v16 }
 0x187   :  { %2549 = vmatpush1.bf16.msra.mxu1 %v3739_v61  ;;  %2581 = vmatpush1.bf16.msra.mxu0 %v3748_v10  ;;  %3189 = vrsqrt.f32 %v3761_v27  ;;  %vm346_vm14 = vcmp.eq.f32.partialorder %v3761_v27, inf  ;;  %v3832_v42 = vpack.c.bf16 %v725_v35, %v721_v34  ;;  %vm348_vm15 = vcmp.eq.f32.partialorder %v3761_v27, 0.0 }
 0x188   :  { %525 = vmatprep.mubr.f32.mxu1 %v3519_v0  ;;  %638 = vmatprep.mubr.f32.mxu0 %v3519_v0  ;;  %v326_v45 = vsel %vm325_vm8, %v3697_v15, %v324_v33  ;;  %v714_v15 = vld [vmem:[#allocation8 + $0x198] sm:$0xff]  ;;  %v723_v33 = vld [vmem:[#allocation8 + $0x1e0] sm:$0xff] }
 0x189   :  { %v3186_v49 = vpop.eup %3185  ;;  %2551 = vmatprep.subr.bf16.mxu1 %v3759_v22  ;;  %v329_v50 = vsel %vm327_vm9, %v328_v39, %v326_v45  ;;  %2583 = vmatprep.subr.bf16.mxu0 %v3765_v30  ;;  %v3804_v14 = vpack.c.bf16 %v718_v58, %v714_v15  ;;  %v3830_v48 = vpack.c.bf16 %v723_v33, %v719_v28 }
 0x18a   :  { %526 = vmatmul.mubr.f32.gmra.mrb[8].mxu1 %v329_v50  ;;  %639 = vmatmul.mubr.f32.gmra.mrb[24].mxu0 %v329_v50  ;;  %v331_v55 = vmul.f32 %v3186_v49, %v3719_v40 }
 0x18b   :  { %2553 = vmatpush1.bf16.msra.mxu1 %v3768_v57  ;;  %2585 = vmatpush1.bf16.msra.mxu0 %v3774_v41 }
 0x18c   :  { %531 = vmatprep.mubr.f32.mxu1 %v3519_v0  ;;  %644 = vmatprep.mubr.f32.mxu0 %v3519_v0  ;;  %v333_v6 = vsel %vm332_vm10, %v3719_v40, %v331_v55  ;;  %v722_v40 = vld [vmem:[#allocation8 + $0x1d8] sm:$0xff] }
 0x18d   :  { %v3188_v47 = vpop.eup %3187  ;;  %2555 = vmatprep.subr.bf16.mxu1 %v3783_v52  ;;  %v336_v11 = vsel %vm334_vm11, %v335_v59, %v333_v6  ;;  %2587 = vmatprep.subr.bf16.mxu0 %v3785_v53  ;;  %v3823_v45 = vpack.c.bf16 %v726_v21, %v722_v40 }
 0x18e   :  { %532 = vmatmul.mubr.f32.gmra.mrb[10].mxu1 %v336_v11  ;;  %645 = vmatmul.mubr.f32.gmra.mrb[26].mxu0 %v336_v11  ;;  %v338_v17 = vmul.f32 %v3188_v47, %v3741_v63 }
 0x18f   :  { %2557 = vmatpush1.bf16.msra.mxu1 %v3792_v62  ;;  %2589 = vmatpush1.bf16.msra.mxu0 %v3794_v1 }
 0x190   :  { %537 = vmatprep.mubr.f32.mxu1 %v3519_v0  ;;  %650 = vmatprep.mubr.f32.mxu0 %v3519_v0  ;;  %v340_v31 = vsel %vm339_vm12, %v3741_v63, %v338_v17  ;;  %v349_v63 = vand.u32 2147483648, %v3761_v27 }
 0x191   :  { %v3190_v38 = vpop.eup %3189  ;;  %2559 = vmatprep.subr.bf16.mxu1 %v3802_v13  ;;  %v343_v39 = vsel %vm341_vm13, %v342_v23, %v340_v31  ;;  %2591 = vmatprep.subr.bf16.mxu0 %v3804_v14 }
 0x192   :  { %538 = vmatmul.mubr.f32.gmra.mrb[12].mxu1 %v343_v39  ;;  %651 = vmatmul.mubr.f32.gmra.mrb[28].mxu0 %v343_v39  ;;  %v345_v46 = vmul.f32 %v3190_v38, %v3761_v27 }
 0x193   :  { %2561 = vmatpush1.bf16.msra.mxu1 %v3811_v24  ;;  %2593 = vmatpush1.bf16.msra.mxu0 %v3813_v25 }
 0x194   :  { %543 = vmatprep.mubr.f32.mxu1 %v3519_v0  ;;  %656 = vmatprep.mubr.f32.mxu0 %v3519_v0  ;;  %v347_v49 = vsel %vm346_vm14, %v3761_v27, %v345_v46  ;;  %v417_v27 = vlaneseq }
 0x195   :  { %2563 = vmatprep.subr.bf16.mxu1 %v3821_v43  ;;  %v350_v50 = vsel %vm348_vm15, %v349_v63, %v347_v49  ;;  %2595 = vmatprep.subr.bf16.mxu0 %v3823_v45 }
 0x196   :  { %544 = vmatmul.mubr.f32.gmra.mrb[14].mxu1 %v350_v50  ;;  %657 = vmatmul.mubr.f32.gmra.mrb[30].mxu0 %v350_v50  ;;  %v418_v54 = vshrl.u32 %v417_v27, 7 }
 0x197   :  { %2565 = vmatpush1.bf16.msra.mxu1 %v3830_v48  ;;  %2597 = vmatpush1.bf16.msra.mxu0 %v3832_v42 }
 0x198   :  { %791 = vmatprep.mubr.f32.mxu1 %v3519_v0  ;;  %862 = vmatprep.mubr.f32.mxu0 %v3519_v0  ;;  %v419_v55 = vsub.s32 0, %v418_v54  ;;  %v423_v15 = vsub.s32 1, %v418_v54  ;;  %v431_v7 = vsub.s32 3, %v418_v54  ;;  %v427_v40 = vsub.s32 2, %v418_v54 }
 0x199   :  { %2599 = vmatprep.subr.bf16.mxu1 %v3676_v29  ;;  %2631 = vmatprep.subr.bf16.mxu0 %v3678_v32 }
 0x19a   :  { %792 = vmatmul.mubr.f32.vlgmr.msra.gmra.mrb[0].mxu1 %v3519_v0  ;;  %863 = vmatmul.mubr.f32.vlgmr.msra.gmra.mrb[16].mxu0 %v3519_v0  ;;  %v3885_v58 = vrot.slane %v415_v56, %v419_v55  ;;  %v3887_v59 = vrot.slane %v415_v56, %v423_v15  ;;  %v3891_v20 = vrot.slane %v415_v56, %v431_v7 }
 0x19b   :  { %2601 = vmatpush1.bf16.msra.mxu1 %v3690_v2  ;;  %2633 = vmatpush1.bf16.msra.mxu0 %v3692_v3  ;;  %v3894_v23 = vrot.slane %v415_v56, %v427_v40 }
 0x19c   :  { %2603 = vmatprep.subr.bf16.mxu1 %v3695_v12  ;;  %2635 = vmatprep.subr.bf16.mxu0 %v3701_v19 }
 0x19d   :  { %961 = vmatprep.mubr.f32.mxu1 %v3519_v0  ;;  %1032 = vmatprep.mubr.f32.mxu0 %v3519_v0 }
 0x19f   :  { %2605 = vmatpush1.bf16.msra.mxu1 %v3699_v18  ;;  %2637 = vmatpush1.bf16.msra.mxu0 %v3704_v26 }
 0x1a0   :  { %2607 = vmatprep.subr.bf16.mxu1 %v3715_v36  ;;  %2639 = vmatprep.subr.bf16.mxu0 %v3723_v44 }
 0x1a3   :  { %2609 = vmatpush1.bf16.msra.mxu1 %v3717_v37  ;;  %2641 = vmatpush1.bf16.msra.mxu0 %v3726_v51 }
 0x1a4   :  { %2611 = vmatprep.subr.bf16.mxu1 %v3737_v60  ;;  %2643 = vmatprep.subr.bf16.mxu0 %v3745_v5 }
 0x1a7   :  { %2613 = vmatpush1.bf16.msra.mxu1 %v3739_v61  ;;  %2645 = vmatpush1.bf16.msra.mxu0 %v3748_v10 }
 0x1a8   :  { %2615 = vmatprep.subr.bf16.mxu1 %v3759_v22  ;;  %2647 = vmatprep.subr.bf16.mxu0 %v3765_v30 }
 0x1ab   :  { %2617 = vmatpush1.bf16.msra.mxu1 %v3768_v57  ;;  %2649 = vmatpush1.bf16.msra.mxu0 %v3774_v41 }
 0x1ac   :  { %2619 = vmatprep.subr.bf16.mxu1 %v3783_v52  ;;  %2651 = vmatprep.subr.bf16.mxu0 %v3785_v53 }
 0x1af   :  { %2621 = vmatpush1.bf16.msra.mxu1 %v3792_v62  ;;  %2653 = vmatpush1.bf16.msra.mxu0 %v3794_v1 }
 0x1b0   :  { %2623 = vmatprep.subr.bf16.mxu1 %v3802_v13  ;;  %2655 = vmatprep.subr.bf16.mxu0 %v3804_v14 }
 0x1b3   :  { %2625 = vmatpush1.bf16.msra.mxu1 %v3811_v24  ;;  %2657 = vmatpush1.bf16.msra.mxu0 %v3813_v25 }
 0x1b4   :  { %2627 = vmatprep.subr.bf16.mxu1 %v3821_v43  ;;  %2659 = vmatprep.subr.bf16.mxu0 %v3823_v45 }
 0x1b7   :  { %2629 = vmatpush1.bf16.msra.mxu1 %v3830_v48  ;;  %2661 = vmatpush1.bf16.msra.mxu0 %v3832_v42 }
 0x1b8   :  { %2663 = vmatprep.subr.bf16.mxu1 %v3676_v29  ;;  %2695 = vmatprep.subr.bf16.mxu0 %v3678_v32 }
 0x26d   :  { %v793_v4 = vpop.f32.mrb[0].mxu1  ;;  %v864_v6 = vpop.f32.mrb[16].mxu0 }
 0x26e   :  { %v3094_v8 = vadd.f32 %v793_v4, %v3885_v58  ;;  %v795_v9 = vpop.f32.mrb[1].mxu1  ;;  %v866_v47 = vpop.f32.mrb[17].mxu0  ;;  %v3110_v31 = vadd.f32 %v864_v6, %v3894_v23 }
 0x26f   :  { %v3095_v11 = vadd.f32 %v795_v9, %v3887_v59  ;;  %v3111_v21 = vadd.f32 %v866_v47, %v3891_v20 }
 0x270   :  { %v2308_v16 = vmul.f32 -1.442695, %v3094_v8 }
 0x271   :  { %v2309_v17 = vmul.f32 -1.442695, %v3095_v11  ;;  %v2310_v28 = vmul.f32 -1.442695, %v3111_v21 }
 0x272   :  { %3191 = vpow2.f32 %v2308_v16 }
 0x273   :  { %3193 = vpow2.f32 %v2309_v17 }
 0x274   :  { %3195 = vpow2.f32 %v2310_v28 }
 0x275   :  { %3197 = vtanh.f32 %v3110_v31 }
 0x27c   :  { %v3192_v33 = vpop.eup %3191 }
 0x27d   :  { %v3194_v34 = vpop.eup %3193  ;;  %v876_v35 = vadd.f32 1.0, %v3192_v33 }
 0x27e   :  { %v882_v38 = vadd.f32 1.0, %v3194_v34  ;;  %v3196_v39 = vpop.eup %3195 }
 0x27f   :  { %3199 = vrcp.f32 %v876_v35  ;;  %v3198_v46 = vpop.eup %3197  ;;  %v889_v27 = vadd.f32 1.0, %v3196_v39 }
 0x280   :  { %3201 = vrcp.f32 %v882_v38 }
 0x281   :  { %3203 = vrcp.f32 %v889_v27 }
 0x289   :  { %v3200_v63 = vpop.eup %3199 }
 0x28a   :  { %v3202_v49 = vpop.eup %3201  ;;  %v893_v50 = vmul.f32 %v3200_v63, %v3198_v46 }
 0x28b   :  { %v892_v54 = vmul.f32 0.0, %v3202_v49  ;;  %v3204_v56 = vpop.eup %3203 }
 0x28d   :  { %v3897_v55 = vadd.f32 %v893_v50, %v892_v54 }
 0x28f   :  { %3205 = vtanh.f32 %v3897_v55 }
 0x299   :  { %v3206_v15 = vpop.eup %3205 }
 0x29a   :  { %v896_v4 = vmul.f32 %v3206_v15, %v3204_v56 }
 0x29c   :  { %962 = vmatmul.mubr.f32.vlgmr.msra.gmra.mrb[2].mxu1 %v896_v4  ;;  %1033 = vmatmul.mubr.f32.vlgmr.msra.gmra.mrb[18].mxu0 %v896_v4 }
 0x29d   :  { %2665 = vmatpush1.bf16.msra.mxu1 %v3690_v2  ;;  %2697 = vmatpush1.bf16.msra.mxu0 %v3692_v3 }
 0x29e   :  { %2667 = vmatprep.subr.bf16.mxu1 %v3695_v12  ;;  %2699 = vmatprep.subr.bf16.mxu0 %v3701_v19 }
 0x29f   :  { %1131 = vmatprep.mubr.f32.mxu1 %v3519_v0  ;;  %1202 = vmatprep.mubr.f32.mxu0 %v3519_v0 }
 0x2a1   :  { %2669 = vmatpush1.bf16.msra.mxu1 %v3699_v18  ;;  %2701 = vmatpush1.bf16.msra.mxu0 %v3704_v26 }
 0x2a2   :  { %2671 = vmatprep.subr.bf16.mxu1 %v3715_v36  ;;  %2703 = vmatprep.subr.bf16.mxu0 %v3723_v44 }
 0x2a5   :  { %2673 = vmatpush1.bf16.msra.mxu1 %v3717_v37  ;;  %2705 = vmatpush1.bf16.msra.mxu0 %v3726_v51 }
 0x2a6   :  { %2675 = vmatprep.subr.bf16.mxu1 %v3737_v60  ;;  %2707 = vmatprep.subr.bf16.mxu0 %v3745_v5 }
 0x2a9   :  { %2677 = vmatpush1.bf16.msra.mxu1 %v3739_v61  ;;  %2709 = vmatpush1.bf16.msra.mxu0 %v3748_v10 }
 0x2aa   :  { %2679 = vmatprep.subr.bf16.mxu1 %v3759_v22  ;;  %2711 = vmatprep.subr.bf16.mxu0 %v3765_v30 }
 0x2ad   :  { %2681 = vmatpush1.bf16.msra.mxu1 %v3768_v57  ;;  %2713 = vmatpush1.bf16.msra.mxu0 %v3774_v41 }
 0x2ae   :  { %2683 = vmatprep.subr.bf16.mxu1 %v3783_v52  ;;  %2715 = vmatprep.subr.bf16.mxu0 %v3785_v53 }
 0x2b1   :  { %2685 = vmatpush1.bf16.msra.mxu1 %v3792_v62  ;;  %2717 = vmatpush1.bf16.msra.mxu0 %v3794_v1 }
 0x2b2   :  { %2687 = vmatprep.subr.bf16.mxu1 %v3802_v13  ;;  %2719 = vmatprep.subr.bf16.mxu0 %v3804_v14 }
 0x2b5   :  { %2689 = vmatpush1.bf16.msra.mxu1 %v3811_v24  ;;  %2721 = vmatpush1.bf16.msra.mxu0 %v3813_v25 }
 0x2b6   :  { %2691 = vmatprep.subr.bf16.mxu1 %v3821_v43  ;;  %2723 = vmatprep.subr.bf16.mxu0 %v3823_v45 }
 0x2b9   :  { %2693 = vmatpush1.bf16.msra.mxu1 %v3830_v48  ;;  %2725 = vmatpush1.bf16.msra.mxu0 %v3832_v42 }
 0x2ba   :  { %2727 = vmatprep.subr.bf16.mxu1 %v3676_v29  ;;  %2759 = vmatprep.subr.bf16.mxu0 %v3678_v32 }
 0x36f   :  { %v963_v6 = vpop.f32.mrb[2].mxu1  ;;  %v1034_v7 = vpop.f32.mrb[18].mxu0 }
 0x370   :  { %v3096_v8 = vadd.f32 %v963_v6, %v3885_v58  ;;  %v965_v9 = vpop.f32.mrb[3].mxu1  ;;  %v1036_v47 = vpop.f32.mrb[19].mxu0  ;;  %v3112_v28 = vadd.f32 %v1034_v7, %v3894_v23 }
 0x371   :  { %v3097_v11 = vadd.f32 %v965_v9, %v3887_v59  ;;  %v3113_v40 = vadd.f32 %v1036_v47, %v3891_v20 }
 0x372   :  { %v2311_v16 = vmul.f32 -1.442695, %v3096_v8 }
 0x373   :  { %v2312_v17 = vmul.f32 -1.442695, %v3097_v11  ;;  %v2313_v21 = vmul.f32 -1.442695, %v3113_v40 }
 0x374   :  { %3207 = vpow2.f32 %v2311_v16 }
 0x375   :  { %3209 = vpow2.f32 %v2312_v17 }
 0x376   :  { %3211 = vpow2.f32 %v2313_v21 }
 0x377   :  { %3213 = vtanh.f32 %v3112_v28 }
 0x37e   :  { %v3208_v31 = vpop.eup %3207 }
 0x37f   :  { %v3210_v33 = vpop.eup %3209  ;;  %v1046_v34 = vadd.f32 1.0, %v3208_v31 }
 0x380   :  { %v1052_v35 = vadd.f32 1.0, %v3210_v33  ;;  %v3212_v38 = vpop.eup %3211 }
 0x381   :  { %3215 = vrcp.f32 %v1046_v34  ;;  %v3214_v39 = vpop.eup %3213  ;;  %v1059_v50 = vadd.f32 1.0, %v3212_v38 }
 0x382   :  { %3217 = vrcp.f32 %v1052_v35 }
 0x383   :  { %3219 = vrcp.f32 %v1059_v50 }
 0x38b   :  { %v3216_v46 = vpop.eup %3215 }
 0x38c   :  { %v3218_v63 = vpop.eup %3217  ;;  %v1063_v49 = vmul.f32 %v3216_v46, %v3214_v39 }
 0x38d   :  { %v1062_v27 = vmul.f32 %v3218_v63, %v3897_v55  ;;  %v3220_v56 = vpop.eup %3219 }
 0x38f   :  { %v3939_v54 = vadd.f32 %v1063_v49, %v1062_v27 }
 0x391   :  { %3221 = vtanh.f32 %v3939_v54 }
 0x39b   :  { %v3222_v15 = vpop.eup %3221 }
 0x39c   :  { %v1066_v4 = vmul.f32 %v3222_v15, %v3220_v56 }
 0x39e   :  { %1132 = vmatmul.mubr.f32.vlgmr.msra.gmra.mrb[4].mxu1 %v1066_v4  ;;  %1203 = vmatmul.mubr.f32.vlgmr.msra.gmra.mrb[20].mxu0 %v1066_v4 }
 0x39f   :  { %2729 = vmatpush1.bf16.msra.mxu1 %v3690_v2  ;;  %2761 = vmatpush1.bf16.msra.mxu0 %v3692_v3 }
 0x3a0   :  { %2731 = vmatprep.subr.bf16.mxu1 %v3695_v12  ;;  %2763 = vmatprep.subr.bf16.mxu0 %v3701_v19 }
 0x3a1   :  { %1301 = vmatprep.mubr.f32.mxu1 %v3519_v0  ;;  %1372 = vmatprep.mubr.f32.mxu0 %v3519_v0 }
 0x3a3   :  { %2733 = vmatpush1.bf16.msra.mxu1 %v3699_v18  ;;  %2765 = vmatpush1.bf16.msra.mxu0 %v3704_v26 }
 0x3a4   :  { %2735 = vmatprep.subr.bf16.mxu1 %v3715_v36  ;;  %2767 = vmatprep.subr.bf16.mxu0 %v3723_v44 }
 0x3a7   :  { %2737 = vmatpush1.bf16.msra.mxu1 %v3717_v37  ;;  %2769 = vmatpush1.bf16.msra.mxu0 %v3726_v51 }
 0x3a8   :  { %2739 = vmatprep.subr.bf16.mxu1 %v3737_v60  ;;  %2771 = vmatprep.subr.bf16.mxu0 %v3745_v5 }
 0x3ab   :  { %2741 = vmatpush1.bf16.msra.mxu1 %v3739_v61  ;;  %2773 = vmatpush1.bf16.msra.mxu0 %v3748_v10 }
 0x3ac   :  { %2743 = vmatprep.subr.bf16.mxu1 %v3759_v22  ;;  %2775 = vmatprep.subr.bf16.mxu0 %v3765_v30 }
 0x3af   :  { %2745 = vmatpush1.bf16.msra.mxu1 %v3768_v57  ;;  %2777 = vmatpush1.bf16.msra.mxu0 %v3774_v41 }
 0x3b0   :  { %2747 = vmatprep.subr.bf16.mxu1 %v3783_v52  ;;  %2779 = vmatprep.subr.bf16.mxu0 %v3785_v53 }
 0x3b3   :  { %2749 = vmatpush1.bf16.msra.mxu1 %v3792_v62  ;;  %2781 = vmatpush1.bf16.msra.mxu0 %v3794_v1 }
 0x3b4   :  { %2751 = vmatprep.subr.bf16.mxu1 %v3802_v13  ;;  %2783 = vmatprep.subr.bf16.mxu0 %v3804_v14 }
 0x3b7   :  { %2753 = vmatpush1.bf16.msra.mxu1 %v3811_v24  ;;  %2785 = vmatpush1.bf16.msra.mxu0 %v3813_v25 }
 0x3b8   :  { %2755 = vmatprep.subr.bf16.mxu1 %v3821_v43  ;;  %2787 = vmatprep.subr.bf16.mxu0 %v3823_v45 }
 0x3bb   :  { %2757 = vmatpush1.bf16.msra.mxu1 %v3830_v48  ;;  %2789 = vmatpush1.bf16.msra.mxu0 %v3832_v42 }
 0x3bc   :  { %2791 = vmatprep.subr.bf16.mxu1 %v3676_v29  ;;  %2823 = vmatprep.subr.bf16.mxu0 %v3678_v32 }
 0x471   :  { %v1133_v55 = vpop.f32.mrb[4].mxu1  ;;  %v1204_v6 = vpop.f32.mrb[20].mxu0 }
 0x472   :  { %v3098_v7 = vadd.f32 %v1133_v55, %v3885_v58  ;;  %v1135_v8 = vpop.f32.mrb[5].mxu1  ;;  %v1206_v9 = vpop.f32.mrb[21].mxu0  ;;  %v3114_v21 = vadd.f32 %v1204_v6, %v3894_v23 }
 0x473   :  { %v3099_v47 = vadd.f32 %v1135_v8, %v3887_v59  ;;  %v3115_v17 = vadd.f32 %v1206_v9, %v3891_v20 }
 0x474   :  { %v2314_v11 = vmul.f32 -1.442695, %v3098_v7 }
 0x475   :  { %v2315_v16 = vmul.f32 -1.442695, %v3099_v47  ;;  %v2316_v40 = vmul.f32 -1.442695, %v3115_v17 }
 0x476   :  { %3223 = vpow2.f32 %v2314_v11 }
 0x477   :  { %3225 = vpow2.f32 %v2315_v16 }
 0x478   :  { %3227 = vpow2.f32 %v2316_v40 }
 0x479   :  { %3229 = vtanh.f32 %v3114_v21 }
 0x480   :  { %v3224_v28 = vpop.eup %3223 }
 0x481   :  { %v3226_v31 = vpop.eup %3225  ;;  %v1216_v33 = vadd.f32 1.0, %v3224_v28 }
 0x482   :  { %v1222_v34 = vadd.f32 1.0, %v3226_v31  ;;  %v3228_v35 = vpop.eup %3227 }
 0x483   :  { %3231 = vrcp.f32 %v1216_v33  ;;  %v3230_v38 = vpop.eup %3229  ;;  %v1229_v49 = vadd.f32 1.0, %v3228_v35 }
 0x484   :  { %3233 = vrcp.f32 %v1222_v34 }
 0x485   :  { %3235 = vrcp.f32 %v1229_v49 }
 0x48d   :  { %v3232_v39 = vpop.eup %3231 }
 0x48e   :  { %v3234_v46 = vpop.eup %3233  ;;  %v1233_v63 = vmul.f32 %v3232_v39, %v3230_v38 }
 0x48f   :  { %v1232_v50 = vmul.f32 %v3234_v46, %v3939_v54  ;;  %v3236_v56 = vpop.eup %3235 }
 0x491   :  { %v3981_v27 = vadd.f32 %v1233_v63, %v1232_v50 }
 0x493   :  { %3237 = vtanh.f32 %v3981_v27 }
 0x49d   :  { %v3238_v15 = vpop.eup %3237 }
 0x49e   :  { %v1236_v4 = vmul.f32 %v3238_v15, %v3236_v56 }
 0x4a0   :  { %1302 = vmatmul.mubr.f32.vlgmr.msra.gmra.mrb[6].mxu1 %v1236_v4  ;;  %1373 = vmatmul.mubr.f32.vlgmr.msra.gmra.mrb[22].mxu0 %v1236_v4 }
 0x4a1   :  { %2793 = vmatpush1.bf16.msra.mxu1 %v3690_v2  ;;  %2825 = vmatpush1.bf16.msra.mxu0 %v3692_v3 }
 0x4a2   :  { %2795 = vmatprep.subr.bf16.mxu1 %v3695_v12  ;;  %2827 = vmatprep.subr.bf16.mxu0 %v3701_v19 }
 0x4a3   :  { %1471 = vmatprep.mubr.f32.mxu1 %v3519_v0  ;;  %1542 = vmatprep.mubr.f32.mxu0 %v3519_v0 }
 0x4a5   :  { %2797 = vmatpush1.bf16.msra.mxu1 %v3699_v18  ;;  %2829 = vmatpush1.bf16.msra.mxu0 %v3704_v26 }
 0x4a6   :  { %2799 = vmatprep.subr.bf16.mxu1 %v3715_v36  ;;  %2831 = vmatprep.subr.bf16.mxu0 %v3723_v44 }
 0x4a9   :  { %2801 = vmatpush1.bf16.msra.mxu1 %v3717_v37  ;;  %2833 = vmatpush1.bf16.msra.mxu0 %v3726_v51 }
 0x4aa   :  { %2803 = vmatprep.subr.bf16.mxu1 %v3737_v60  ;;  %2835 = vmatprep.subr.bf16.mxu0 %v3745_v5 }
 0x4ad   :  { %2805 = vmatpush1.bf16.msra.mxu1 %v3739_v61  ;;  %2837 = vmatpush1.bf16.msra.mxu0 %v3748_v10 }
 0x4ae   :  { %2807 = vmatprep.subr.bf16.mxu1 %v3759_v22  ;;  %2839 = vmatprep.subr.bf16.mxu0 %v3765_v30 }
 0x4b1   :  { %2809 = vmatpush1.bf16.msra.mxu1 %v3768_v57  ;;  %2841 = vmatpush1.bf16.msra.mxu0 %v3774_v41 }
 0x4b2   :  { %2811 = vmatprep.subr.bf16.mxu1 %v3783_v52  ;;  %2843 = vmatprep.subr.bf16.mxu0 %v3785_v53 }
 0x4b5   :  { %2813 = vmatpush1.bf16.msra.mxu1 %v3792_v62  ;;  %2845 = vmatpush1.bf16.msra.mxu0 %v3794_v1 }
 0x4b6   :  { %2815 = vmatprep.subr.bf16.mxu1 %v3802_v13  ;;  %2847 = vmatprep.subr.bf16.mxu0 %v3804_v14 }
 0x4b9   :  { %2817 = vmatpush1.bf16.msra.mxu1 %v3811_v24  ;;  %2849 = vmatpush1.bf16.msra.mxu0 %v3813_v25 }
 0x4ba   :  { %2819 = vmatprep.subr.bf16.mxu1 %v3821_v43  ;;  %2851 = vmatprep.subr.bf16.mxu0 %v3823_v45 }
 0x4bd   :  { %2821 = vmatpush1.bf16.msra.mxu1 %v3830_v48  ;;  %2853 = vmatpush1.bf16.msra.mxu0 %v3832_v42 }
 0x4be   :  { %2855 = vmatprep.subr.bf16.mxu1 %v3676_v29  ;;  %2887 = vmatprep.subr.bf16.mxu0 %v3678_v32 }
 0x573   :  { %v1303_v54 = vpop.f32.mrb[6].mxu1  ;;  %v1374_v55 = vpop.f32.mrb[22].mxu0 }
 0x574   :  { %v3100_v6 = vadd.f32 %v1303_v54, %v3885_v58  ;;  %v1305_v7 = vpop.f32.mrb[7].mxu1  ;;  %v1376_v8 = vpop.f32.mrb[23].mxu0  ;;  %v3116_v40 = vadd.f32 %v1374_v55, %v3894_v23 }
 0x575   :  { %v3101_v9 = vadd.f32 %v1305_v7, %v3887_v59  ;;  %v3117_v16 = vadd.f32 %v1376_v8, %v3891_v20 }
 0x576   :  { %v2317_v47 = vmul.f32 -1.442695, %v3100_v6 }
 0x577   :  { %v2318_v11 = vmul.f32 -1.442695, %v3101_v9  ;;  %v2319_v17 = vmul.f32 -1.442695, %v3117_v16 }
 0x578   :  { %3239 = vpow2.f32 %v2317_v47 }
 0x579   :  { %3241 = vpow2.f32 %v2318_v11 }
 0x57a   :  { %3243 = vpow2.f32 %v2319_v17 }
 0x57b   :  { %3245 = vtanh.f32 %v3116_v40 }
 0x582   :  { %v3240_v21 = vpop.eup %3239 }
 0x583   :  { %v3242_v28 = vpop.eup %3241  ;;  %v1386_v31 = vadd.f32 1.0, %v3240_v21 }
 0x584   :  { %v1392_v33 = vadd.f32 1.0, %v3242_v28  ;;  %v3244_v34 = vpop.eup %3243 }
 0x585   :  { %3247 = vrcp.f32 %v1386_v31  ;;  %v3246_v35 = vpop.eup %3245  ;;  %v1399_v63 = vadd.f32 1.0, %v3244_v34 }
 0x586   :  { %3249 = vrcp.f32 %v1392_v33 }
 0x587   :  { %3251 = vrcp.f32 %v1399_v63 }
 0x58f   :  { %v3248_v38 = vpop.eup %3247 }
 0x590   :  { %v3250_v39 = vpop.eup %3249  ;;  %v1403_v46 = vmul.f32 %v3248_v38, %v3246_v35 }
 0x591   :  { %v1402_v49 = vmul.f32 %v3250_v39, %v3981_v27  ;;  %v3252_v56 = vpop.eup %3251 }
 0x593   :  { %v4023_v50 = vadd.f32 %v1403_v46, %v1402_v49 }
 0x595   :  { %3253 = vtanh.f32 %v4023_v50 }
 0x59f   :  { %v3254_v15 = vpop.eup %3253 }
 0x5a0   :  { %v1406_v4 = vmul.f32 %v3254_v15, %v3252_v56 }
 0x5a2   :  { %1472 = vmatmul.mubr.f32.vlgmr.msra.gmra.mrb[8].mxu1 %v1406_v4  ;;  %1543 = vmatmul.mubr.f32.vlgmr.msra.gmra.mrb[24].mxu0 %v1406_v4 }
 0x5a3   :  { %2857 = vmatpush1.bf16.msra.mxu1 %v3690_v2  ;;  %2889 = vmatpush1.bf16.msra.mxu0 %v3692_v3 }
 0x5a4   :  { %2859 = vmatprep.subr.bf16.mxu1 %v3695_v12  ;;  %2891 = vmatprep.subr.bf16.mxu0 %v3701_v19 }
 0x5a5   :  { %1641 = vmatprep.mubr.f32.mxu1 %v3519_v0  ;;  %1712 = vmatprep.mubr.f32.mxu0 %v3519_v0 }
 0x5a7   :  { %2861 = vmatpush1.bf16.msra.mxu1 %v3699_v18  ;;  %2893 = vmatpush1.bf16.msra.mxu0 %v3704_v26 }
 0x5a8   :  { %2863 = vmatprep.subr.bf16.mxu1 %v3715_v36  ;;  %2895 = vmatprep.subr.bf16.mxu0 %v3723_v44 }
 0x5ab   :  { %2865 = vmatpush1.bf16.msra.mxu1 %v3717_v37  ;;  %2897 = vmatpush1.bf16.msra.mxu0 %v3726_v51 }
 0x5ac   :  { %2867 = vmatprep.subr.bf16.mxu1 %v3737_v60  ;;  %2899 = vmatprep.subr.bf16.mxu0 %v3745_v5 }
 0x5af   :  { %2869 = vmatpush1.bf16.msra.mxu1 %v3739_v61  ;;  %2901 = vmatpush1.bf16.msra.mxu0 %v3748_v10 }
 0x5b0   :  { %2871 = vmatprep.subr.bf16.mxu1 %v3759_v22  ;;  %2903 = vmatprep.subr.bf16.mxu0 %v3765_v30 }
 0x5b3   :  { %2873 = vmatpush1.bf16.msra.mxu1 %v3768_v57  ;;  %2905 = vmatpush1.bf16.msra.mxu0 %v3774_v41 }
 0x5b4   :  { %2875 = vmatprep.subr.bf16.mxu1 %v3783_v52  ;;  %2907 = vmatprep.subr.bf16.mxu0 %v3785_v53 }
 0x5b7   :  { %2877 = vmatpush1.bf16.msra.mxu1 %v3792_v62  ;;  %2909 = vmatpush1.bf16.msra.mxu0 %v3794_v1 }
 0x5b8   :  { %2879 = vmatprep.subr.bf16.mxu1 %v3802_v13  ;;  %2911 = vmatprep.subr.bf16.mxu0 %v3804_v14 }
 0x5bb   :  { %2881 = vmatpush1.bf16.msra.mxu1 %v3811_v24  ;;  %2913 = vmatpush1.bf16.msra.mxu0 %v3813_v25 }
 0x5bc   :  { %2883 = vmatprep.subr.bf16.mxu1 %v3821_v43  ;;  %2915 = vmatprep.subr.bf16.mxu0 %v3823_v45 }
 0x5bf   :  { %2885 = vmatpush1.bf16.msra.mxu1 %v3830_v48  ;;  %2917 = vmatpush1.bf16.msra.mxu0 %v3832_v42 }
 0x5c0   :  { %2919 = vmatprep.subr.bf16.mxu1 %v3676_v29  ;;  %2951 = vmatprep.subr.bf16.mxu0 %v3678_v32 }
 0x675   :  { %v1473_v27 = vpop.f32.mrb[8].mxu1  ;;  %v1544_v54 = vpop.f32.mrb[24].mxu0 }
 0x676   :  { %v3102_v55 = vadd.f32 %v1473_v27, %v3885_v58  ;;  %v1475_v6 = vpop.f32.mrb[9].mxu1  ;;  %v1546_v7 = vpop.f32.mrb[25].mxu0  ;;  %v3118_v17 = vadd.f32 %v1544_v54, %v3894_v23 }
 0x677   :  { %v3103_v8 = vadd.f32 %v1475_v6, %v3887_v59  ;;  %v3119_v11 = vadd.f32 %v1546_v7, %v3891_v20 }
 0x678   :  { %v2320_v9 = vmul.f32 -1.442695, %v3102_v55 }
 0x679   :  { %v2321_v47 = vmul.f32 -1.442695, %v3103_v8  ;;  %v2322_v16 = vmul.f32 -1.442695, %v3119_v11 }
 0x67a   :  { %3255 = vpow2.f32 %v2320_v9 }
 0x67b   :  { %3257 = vpow2.f32 %v2321_v47 }
 0x67c   :  { %3259 = vpow2.f32 %v2322_v16 }
 0x67d   :  { %3261 = vtanh.f32 %v3118_v17 }
 0x684   :  { %v3256_v40 = vpop.eup %3255 }
 0x685   :  { %v3258_v21 = vpop.eup %3257  ;;  %v1556_v28 = vadd.f32 1.0, %v3256_v40 }
 0x686   :  { %v1562_v31 = vadd.f32 1.0, %v3258_v21  ;;  %v3260_v33 = vpop.eup %3259 }
 0x687   :  { %3263 = vrcp.f32 %v1556_v28  ;;  %v3262_v34 = vpop.eup %3261  ;;  %v1569_v46 = vadd.f32 1.0, %v3260_v33 }
 0x688   :  { %3265 = vrcp.f32 %v1562_v31 }
 0x689   :  { %3267 = vrcp.f32 %v1569_v46 }
 0x691   :  { %v3264_v35 = vpop.eup %3263 }
 0x692   :  { %v3266_v38 = vpop.eup %3265  ;;  %v1573_v39 = vmul.f32 %v3264_v35, %v3262_v34 }
 0x693   :  { %v1572_v63 = vmul.f32 %v3266_v38, %v4023_v50  ;;  %v3268_v56 = vpop.eup %3267 }
 0x695   :  { %v4065_v49 = vadd.f32 %v1573_v39, %v1572_v63 }
 0x697   :  { %3269 = vtanh.f32 %v4065_v49 }
 0x6a1   :  { %v3270_v15 = vpop.eup %3269 }
 0x6a2   :  { %v1576_v4 = vmul.f32 %v3270_v15, %v3268_v56  ;;  %v2090_v15 = vld [vmem:[#allocation10 + $0x18] sm:$0xff] }
 0x6a4   :  { %1642 = vmatmul.mubr.f32.vlgmr.msra.gmra.mrb[10].mxu1 %v1576_v4  ;;  %1713 = vmatmul.mubr.f32.vlgmr.msra.gmra.mrb[26].mxu0 %v1576_v4 }
 0x6a5   :  { %2921 = vmatpush1.bf16.msra.mxu1 %v3690_v2  ;;  %2953 = vmatpush1.bf16.msra.mxu0 %v3692_v3 }
 0x6a6   :  { %2923 = vmatprep.subr.bf16.mxu1 %v3695_v12  ;;  %2955 = vmatprep.subr.bf16.mxu0 %v3701_v19 }
 0x6a7   :  { %1811 = vmatprep.mubr.f32.mxu1 %v3519_v0  ;;  %1882 = vmatprep.mubr.f32.mxu0 %v3519_v0 }
 0x6a9   :  { %2925 = vmatpush1.bf16.msra.mxu1 %v3699_v18  ;;  %2957 = vmatpush1.bf16.msra.mxu0 %v3704_v26 }
 0x6aa   :  { %2927 = vmatprep.subr.bf16.mxu1 %v3715_v36  ;;  %2959 = vmatprep.subr.bf16.mxu0 %v3723_v44 }
 0x6ad   :  { %2929 = vmatpush1.bf16.msra.mxu1 %v3717_v37  ;;  %2961 = vmatpush1.bf16.msra.mxu0 %v3726_v51 }
 0x6ae   :  { %2931 = vmatprep.subr.bf16.mxu1 %v3737_v60  ;;  %2963 = vmatprep.subr.bf16.mxu0 %v3745_v5 }
 0x6b1   :  { %2933 = vmatpush1.bf16.msra.mxu1 %v3739_v61  ;;  %2965 = vmatpush1.bf16.msra.mxu0 %v3748_v10 }
 0x6b2   :  { %2935 = vmatprep.subr.bf16.mxu1 %v3759_v22  ;;  %2967 = vmatprep.subr.bf16.mxu0 %v3765_v30 }
 0x6b5   :  { %2937 = vmatpush1.bf16.msra.mxu1 %v3768_v57  ;;  %2969 = vmatpush1.bf16.msra.mxu0 %v3774_v41 }
 0x6b6   :  { %2939 = vmatprep.subr.bf16.mxu1 %v3783_v52  ;;  %2971 = vmatprep.subr.bf16.mxu0 %v3785_v53 }
 0x6b9   :  { %2941 = vmatpush1.bf16.msra.mxu1 %v3792_v62  ;;  %2973 = vmatpush1.bf16.msra.mxu0 %v3794_v1 }
 0x6ba   :  { %2943 = vmatprep.subr.bf16.mxu1 %v3802_v13  ;;  %2975 = vmatprep.subr.bf16.mxu0 %v3804_v14 }
 0x6bd   :  { %2945 = vmatpush1.bf16.msra.mxu1 %v3811_v24  ;;  %2977 = vmatpush1.bf16.msra.mxu0 %v3813_v25 }
 0x6be   :  { %2947 = vmatprep.subr.bf16.mxu1 %v3821_v43  ;;  %2979 = vmatprep.subr.bf16.mxu0 %v3823_v45 }
 0x6c1   :  { %2949 = vmatpush1.bf16.msra.mxu1 %v3830_v48  ;;  %2981 = vmatpush1.bf16.msra.mxu0 %v3832_v42 }
 0x6c2   :  { %2983 = vmatprep.subr.bf16.mxu1 %v3676_v29  ;;  %3015 = vmatprep.subr.bf16.mxu0 %v3678_v32 }
 0x777   :  { %v1643_v50 = vpop.f32.mrb[10].mxu1  ;;  %v1714_v27 = vpop.f32.mrb[26].mxu0 }
 0x778   :  { %v3104_v54 = vadd.f32 %v1643_v50, %v3885_v58  ;;  %v1645_v55 = vpop.f32.mrb[11].mxu1  ;;  %v1716_v6 = vpop.f32.mrb[27].mxu0  ;;  %v3120_v16 = vadd.f32 %v1714_v27, %v3894_v23  ;;  %v2091_v50 = vld [vmem:[#allocation10 + $0x20] sm:$0xff]  ;;  %v2092_v27 = vld [vmem:[#allocation10 + $0x28] sm:$0xff] }
 0x779   :  { %v3105_v7 = vadd.f32 %v1645_v55, %v3887_v59  ;;  %v3121_v47 = vadd.f32 %v1716_v6, %v3891_v20  ;;  %v2093_v55 = vld [vmem:[#allocation10 + $0x30] sm:$0xff]  ;;  %v2094_v6 = vld [vmem:[#allocation10 + $0x38] sm:$0xff] }
 0x77a   :  { %v2323_v8 = vmul.f32 -1.442695, %v3104_v54  ;;  %v3053_v54 = vpack.c.bf16 %v2092_v27, %v2091_v50 }
 0x77b   :  { %v2324_v9 = vmul.f32 -1.442695, %v3105_v7  ;;  %v2325_v11 = vmul.f32 -1.442695, %v3121_v47  ;;  %v3056_v7 = vpack.c.bf16 %v2094_v6, %v2093_v55  ;;  %v2196_v55 = vld [vmem:[#allocation11 + $0x78] sm:$0xff] }
 0x77c   :  { %3271 = vpow2.f32 %v2323_v8  ;;  %v2095_v8 = vld [vmem:[#allocation10 + $0x40] sm:$0xff] }
 0x77d   :  { %3273 = vpow2.f32 %v2324_v9  ;;  %v2096_v9 = vld [vmem:[#allocation10 + $0x48] sm:$0xff] }
 0x77e   :  { %3275 = vpow2.f32 %v2325_v11  ;;  %v3059_v47 = vpack.c.bf16 %v2096_v9, %v2095_v8  ;;  %v2097_v11 = vld [vmem:[#allocation10 + $0x50] sm:$0xff] }
 0x77f   :  { %3277 = vtanh.f32 %v3120_v16  ;;  %v2098_v16 = vld [vmem:[#allocation10 + $0x58] sm:$0xff] }
 0x786   :  { %v3272_v29 = vpop.eup %3271 }
 0x787   :  { %v3274_v17 = vpop.eup %3273  ;;  %v1726_v32 = vadd.f32 1.0, %v3272_v29  ;;  %v2099_v29 = vld [vmem:[#allocation10 + $0x60] sm:$0xff] }
 0x788   :  { %v1732_v40 = vadd.f32 1.0, %v3274_v17  ;;  %v3276_v21 = vpop.eup %3275  ;;  %v3062_v17 = vpack.c.bf16 %v2098_v16, %v2097_v11 }
 0x789   :  { %3279 = vrcp.f32 %v1726_v32  ;;  %v3278_v28 = vpop.eup %3277  ;;  %v1739_v35 = vadd.f32 1.0, %v3276_v21  ;;  %v2100_v32 = vld [vmem:[#allocation10 + $0x68] sm:$0xff]  ;;  %v2101_v21 = vld [vmem:[#allocation10 + $0x70] sm:$0xff] }
 0x78a   :  { %3281 = vrcp.f32 %v1732_v40  ;;  %v3065_v40 = vpack.c.bf16 %v2100_v32, %v2099_v29 }
 0x78b   :  { %3283 = vrcp.f32 %v1739_v35  ;;  %v2183_v35 = vld [vmem:[#allocation11 + $0x10] sm:$0xff] }
 0x793   :  { %v3280_v31 = vpop.eup %3279 }
 0x794   :  { %v3282_v33 = vpop.eup %3281  ;;  %v1743_v34 = vmul.f32 %v3280_v31, %v3278_v28  ;;  %v2102_v28 = vld [vmem:[#allocation10 + $0x78] sm:$0xff] }
 0x795   :  { %v1742_v38 = vmul.f32 %v3282_v33, %v4065_v49  ;;  %v3284_v46 = vpop.eup %3283  ;;  %v2089_v49 = vld [vmem:[#allocation10 + $0x10] sm:$0xff]  ;;  %v3068_v31 = vpack.c.bf16 %v2102_v28, %v2101_v21  ;;  %v2181_v33 = vld [vmem:[#allocation11] sm:$0xff] }
 0x796   :  { %v3050_v4 = vpack.c.bf16 %v2090_v15, %v2089_v49 }
 0x797   :  { %v4107_v39 = vadd.f32 %v1743_v34, %v1742_v38  ;;  %v2182_v34 = vld [vmem:[#allocation11 + $0x8] sm:$0xff] }
 0x798   :  { %v3071_v38 = vpack.c.bf16 %v2182_v34, %v2181_v33 }
 0x799   :  { %3285 = vtanh.f32 %v4107_v39 }
 0x7a3   :  { %v3286_v63 = vpop.eup %3285 }
 0x7a4   :  { %v1746_v56 = vmul.f32 %v3286_v63, %v3284_v46  ;;  %v2186_v63 = vld [vmem:[#allocation11 + $0x28] sm:$0xff] }
 0x7a6   :  { %1812 = vmatmul.mubr.f32.vlgmr.msra.gmra.mrb[12].mxu1 %v1746_v56  ;;  %1883 = vmatmul.mubr.f32.vlgmr.msra.gmra.mrb[28].mxu0 %v1746_v56 }
 0x7a7   :  { %2985 = vmatpush1.bf16.msra.mxu1 %v3690_v2  ;;  %3017 = vmatpush1.bf16.msra.mxu0 %v3692_v3 }
 0x7a8   :  { %2987 = vmatprep.subr.bf16.mxu1 %v3695_v12  ;;  %3019 = vmatprep.subr.bf16.mxu0 %v3701_v19 }
 0x7a9   :  { %1981 = vmatprep.mubr.f32.mxu1 %v3519_v0  ;;  %2052 = vmatprep.mubr.f32.mxu0 %v3519_v0 }
 0x7ab   :  { %2989 = vmatpush1.bf16.msra.mxu1 %v3699_v18  ;;  %3021 = vmatpush1.bf16.msra.mxu0 %v3704_v26 }
 0x7ac   :  { %2991 = vmatprep.subr.bf16.mxu1 %v3715_v36  ;;  %3023 = vmatprep.subr.bf16.mxu0 %v3723_v44 }
 0x7af   :  { %2993 = vmatpush1.bf16.msra.mxu1 %v3717_v37  ;;  %3025 = vmatpush1.bf16.msra.mxu0 %v3726_v51 }
 0x7b0   :  { %2995 = vmatprep.subr.bf16.mxu1 %v3737_v60  ;;  %3027 = vmatprep.subr.bf16.mxu0 %v3745_v5 }
 0x7b3   :  { %2997 = vmatpush1.bf16.msra.mxu1 %v3739_v61  ;;  %3029 = vmatpush1.bf16.msra.mxu0 %v3748_v10 }
 0x7b4   :  { %2999 = vmatprep.subr.bf16.mxu1 %v3759_v22  ;;  %3031 = vmatprep.subr.bf16.mxu0 %v3765_v30 }
 0x7b7   :  { %3001 = vmatpush1.bf16.msra.mxu1 %v3768_v57  ;;  %3033 = vmatpush1.bf16.msra.mxu0 %v3774_v41 }
 0x7b8   :  { %3003 = vmatprep.subr.bf16.mxu1 %v3783_v52  ;;  %3035 = vmatprep.subr.bf16.mxu0 %v3785_v53 }
 0x7bb   :  { %3005 = vmatpush1.bf16.msra.mxu1 %v3792_v62  ;;  %3037 = vmatpush1.bf16.msra.mxu0 %v3794_v1 }
 0x7bc   :  { %3007 = vmatprep.subr.bf16.mxu1 %v3802_v13  ;;  %3039 = vmatprep.subr.bf16.mxu0 %v3804_v14 }
 0x7bf   :  { %3009 = vmatpush1.bf16.msra.mxu1 %v3811_v24  ;;  %3041 = vmatpush1.bf16.msra.mxu0 %v3813_v25 }
 0x7c0   :  { %3011 = vmatprep.subr.bf16.mxu1 %v3821_v43  ;;  %3043 = vmatprep.subr.bf16.mxu0 %v3823_v45  ;;  %v2087_v43 = vld [vmem:[#allocation10] sm:$0xff]  ;;  %v2088_v45 = vld [vmem:[#allocation10 + $0x8] sm:$0xff] }
 0x7c3   :  { %3013 = vmatpush1.bf16.msra.mxu1 %v3830_v48  ;;  %3045 = vmatpush1.bf16.msra.mxu0 %v3832_v42  ;;  %v3047_v48 = vpack.c.bf16 %v2088_v45, %v2087_v43  ;;  %v3520_v42 = vmov 0.0|0.0  }
 0x7c4   :  { %3046 = vmatprep.subr.bf16.mxu1 %v3520_v42  ;;  %3070 = vmatprep.subr.bf16.mxu0 %v3520_v42 }
 0x879   :  { %v1813_v2 = vpop.f32.mrb[12].mxu1  ;;  %v1884_v3 = vpop.f32.mrb[28].mxu0 }
 0x87a   :  { %v3106_v12 = vadd.f32 %v1813_v2, %v3885_v58  ;;  %v1815_v18 = vpop.f32.mrb[13].mxu1  ;;  %v1886_v19 = vpop.f32.mrb[29].mxu0  ;;  %v3122_v60 = vadd.f32 %v1884_v3, %v3894_v23  ;;  %v2187_v2 = vld [vmem:[#allocation11 + $0x30] sm:$0xff]  ;;  %v2188_v3 = vld [vmem:[#allocation11 + $0x38] sm:$0xff] }
 0x87b   :  { %v3107_v26 = vadd.f32 %v1815_v18, %v3887_v59  ;;  %v3123_v44 = vadd.f32 %v1886_v19, %v3891_v20  ;;  %v2189_v18 = vld [vmem:[#allocation11 + $0x40] sm:$0xff]  ;;  %v2190_v19 = vld [vmem:[#allocation11 + $0x48] sm:$0xff] }
 0x87c   :  { %v2326_v36 = vmul.f32 -1.442695, %v3106_v12  ;;  %v3080_v12 = vpack.c.bf16 %v2188_v3, %v2187_v2 }
 0x87d   :  { %v2327_v37 = vmul.f32 -1.442695, %v3107_v26  ;;  %v2328_v51 = vmul.f32 -1.442695, %v3123_v44  ;;  %v3083_v26 = vpack.c.bf16 %v2190_v19, %v2189_v18 }
 0x87e   :  { %3287 = vpow2.f32 %v2326_v36  ;;  %v2191_v36 = vld [vmem:[#allocation11 + $0x50] sm:$0xff] }
 0x87f   :  { %3289 = vpow2.f32 %v2327_v37  ;;  %v2192_v37 = vld [vmem:[#allocation11 + $0x58] sm:$0xff] }
 0x880   :  { %3291 = vpow2.f32 %v2328_v51  ;;  %v3086_v44 = vpack.c.bf16 %v2192_v37, %v2191_v36  ;;  %v2193_v51 = vld [vmem:[#allocation11 + $0x60] sm:$0xff] }
 0x881   :  { %3293 = vtanh.f32 %v3122_v60  ;;  %v2194_v60 = vld [vmem:[#allocation11 + $0x68] sm:$0xff] }
 0x888   :  { %v3288_v61 = vpop.eup %3287 }
 0x889   :  { %v3290_v5 = vpop.eup %3289  ;;  %v1896_v10 = vadd.f32 1.0, %v3288_v61  ;;  %v3089_v61 = vpack.c.bf16 %v2194_v60, %v2193_v51 }
 0x88a   :  { %v1902_v22 = vadd.f32 1.0, %v3290_v5  ;;  %v3292_v30 = vpop.eup %3291 }
 0x88b   :  { %3295 = vrcp.f32 %v1896_v10  ;;  %v3294_v57 = vpop.eup %3293  ;;  %v1909_v62 = vadd.f32 1.0, %v3292_v30 }
 0x88c   :  { %3297 = vrcp.f32 %v1902_v22 }
 0x88d   :  { %3299 = vrcp.f32 %v1909_v62 }
 0x895   :  { %v3296_v41 = vpop.eup %3295 }
 0x896   :  { %v3298_v52 = vpop.eup %3297  ;;  %v1913_v53 = vmul.f32 %v3296_v41, %v3294_v57 }
 0x897   :  { %v1912_v1 = vmul.f32 %v3298_v52, %v4107_v39  ;;  %v3300_v14 = vpop.eup %3299  ;;  %v2184_v39 = vld [vmem:[#allocation11 + $0x18] sm:$0xff] }
 0x898   :  { %v3074_v46 = vpack.c.bf16 %v2184_v39, %v2183_v35 }
 0x899   :  { %v4147_v13 = vadd.f32 %v1913_v53, %v1912_v1 }
 0x89b   :  { %3301 = vtanh.f32 %v4147_v13 }
 0x8a5   :  { %v3302_v24 = vpop.eup %3301 }
 0x8a6   :  { %v1916_v25 = vmul.f32 %v3302_v24, %v3300_v14 }
 0x8a8   :  { %1982 = vmatmul.mubr.f32.vlgmr.msra.gmra.mrb[14].mxu1 %v1916_v25  ;;  %2053 = vmatmul.mubr.f32.vlgmr.msra.gmra.mrb[30].mxu0 %v1916_v25 }
 0x8a9   :  { %3048 = vmatpush3.bf16.msra.mxu1 %v3047_v48  ;;  %2400 = vmatprep.mubr.msk.f32.mxu1 %vm3521_vm0, %v3519_v0 }
 0x8aa   :  { %3049 = vmatprep.subr.bf16.mxu1 %v3520_v42  ;;  %2435 = vmatprep.mubr.msk.f32.mxu0 %vm3521_vm0, %v3519_v0  ;;  %v2185_v0 = vld [vmem:[#allocation11 + $0x20] sm:$0xff] }
 0x8ab   :  { %3072 = vmatpush3.bf16.msra.mxu0 %v3071_v38  ;;  %v3077_v56 = vpack.c.bf16 %v2186_v63, %v2185_v0 }
 0x8ac   :  { %3073 = vmatprep.subr.bf16.mxu0 %v3520_v42 }
 0x8ad   :  { %3051 = vmatpush3.bf16.msra.mxu1 %v3050_v4 }
 0x8ae   :  { %3052 = vmatprep.subr.bf16.mxu1 %v3520_v42 }
 0x8af   :  { %3075 = vmatpush3.bf16.msra.mxu0 %v3074_v46 }
 0x8b0   :  { %3076 = vmatprep.subr.bf16.mxu0 %v3520_v42 }
 0x8b1   :  { %3054 = vmatpush3.bf16.msra.mxu1 %v3053_v54  ;;  %v2195_v54 = vld [vmem:[#allocation11 + $0x70] sm:$0xff] }
 0x8b2   :  { %3055 = vmatprep.subr.bf16.mxu1 %v3520_v42  ;;  %v3092_v6 = vpack.c.bf16 %v2196_v55, %v2195_v54 }
 0x8b3   :  { %3078 = vmatpush3.bf16.msra.mxu0 %v3077_v56 }
 0x8b4   :  { %3079 = vmatprep.subr.bf16.mxu0 %v3520_v42 }
 0x8b5   :  { %3057 = vmatpush3.bf16.msra.mxu1 %v3056_v7  ;;  %v2332_v7 = vld [vmem:[%s4209_s6] ss:$0 sm:$0xff] }
 0x8b6   :  { %3058 = vmatprep.subr.bf16.mxu1 %v3520_v42 }
 0x8b7   :  { %3081 = vmatpush3.bf16.msra.mxu0 %v3080_v12 }
 0x8b8   :  { %3082 = vmatprep.subr.bf16.mxu0 %v3520_v42 }
 0x8b9   :  { %3060 = vmatpush3.bf16.msra.mxu1 %v3059_v47 }
 0x8ba   :  { %3061 = vmatprep.subr.bf16.mxu1 %v3520_v42 }
 0x8bb   :  { %3084 = vmatpush3.bf16.msra.mxu0 %v3083_v26 }
 0x8bc   :  { %3085 = vmatprep.subr.bf16.mxu0 %v3520_v42 }
 0x8bd   :  { %3063 = vmatpush3.bf16.msra.mxu1 %v3062_v17 }
 0x8be   :  { %3064 = vmatprep.subr.bf16.mxu1 %v3520_v42 }
 0x8bf   :  { %3087 = vmatpush3.bf16.msra.mxu0 %v3086_v44 }
 0x8c0   :  { %3088 = vmatprep.subr.bf16.mxu0 %v3520_v42 }
 0x8c1   :  { %3066 = vmatpush3.bf16.msra.mxu1 %v3065_v40 }
 0x8c2   :  { %3067 = vmatprep.subr.bf16.mxu1 %v3520_v42 }
 0x8c3   :  { %3090 = vmatpush3.bf16.msra.mxu0 %v3089_v61 }
 0x8c4   :  { %3091 = vmatprep.subr.bf16.mxu0 %v3520_v42 }
 0x8c5   :  { %3069 = vmatpush3.bf16.msra.mxu1 %v3068_v31 }
 0x8c7   :  { %3093 = vmatpush3.bf16.msra.mxu0 %v3092_v6 }
 0x97b   :  { %v1983_v5 = vpop.f32.mrb[14].mxu1  ;;  %v2054_v10 = vpop.f32.mrb[30].mxu0 }
 0x97c   :  { %v3108_v22 = vadd.f32 %v1983_v5, %v3885_v58  ;;  %v1985_v30 = vpop.f32.mrb[15].mxu1  ;;  %v2056_v57 = vpop.f32.mrb[31].mxu0  ;;  %v3124_v14 = vadd.f32 %v2054_v10, %v3894_v23 }
 0x97d   :  { %v3109_v41 = vadd.f32 %v1985_v30, %v3887_v59  ;;  %v3125_v62 = vadd.f32 %v2056_v57, %v3891_v20 }
 0x97e   :  { %v2329_v52 = vmul.f32 -1.442695, %v3108_v22 }
 0x97f   :  { %v2330_v53 = vmul.f32 -1.442695, %v3109_v41  ;;  %v2331_v1 = vmul.f32 -1.442695, %v3125_v62 }
 0x980   :  { %3303 = vpow2.f32 %v2329_v52 }
 0x981   :  { %3305 = vpow2.f32 %v2330_v53 }
 0x982   :  { %3307 = vpow2.f32 %v2331_v1 }
 0x983   :  { %3309 = vtanh.f32 %v3124_v14 }
 0x98a   :  { %v3304_v24 = vpop.eup %3303 }
 0x98b   :  { %v3306_v25 = vpop.eup %3305  ;;  %v2066_v43 = vadd.f32 1.0, %v3304_v24 }
 0x98c   :  { %v2072_v45 = vadd.f32 1.0, %v3306_v25  ;;  %v3308_v58 = vpop.eup %3307 }
 0x98d   :  { %3311 = vrcp.f32 %v2066_v43  ;;  %v3310_v48 = vpop.eup %3309  ;;  %v2079_v15 = vadd.f32 1.0, %v3308_v58 }
 0x98e   :  { %3313 = vrcp.f32 %v2072_v45 }
 0x98f   :  { %3315 = vrcp.f32 %v2079_v15 }
 0x997   :  { %v3312_v59 = vpop.eup %3311 }
 0x998   :  { %v3314_v42 = vpop.eup %3313  ;;  %v2083_v49 = vmul.f32 %v3312_v59, %v3310_v48 }
 0x999   :  { %v2082_v4 = vmul.f32 %v3314_v42, %v4147_v13  ;;  %v3316_v23 = vpop.eup %3315 }
 0x99b   :  { %v2084_v20 = vadd.f32 %v2083_v49, %v2082_v4 }
 0x99d   :  { %3317 = vtanh.f32 %v2084_v20 }
 0x9a7   :  { %v3318_v50 = vpop.eup %3317 }
 0x9a8   :  { %v2086_v27 = vmul.f32 %v3318_v50, %v3316_v23 }
 0x9aa   :  { %2401 = vmatmul.mubr.f32.vlgmr.msra.gmra.mrb[16].mxu1 %v2086_v27 }
 0xa7d   :  { %v2176_v8 = vpop.f32.mrb[16].mxu1 }
 0xa7e   :  { %v2177_v9 = vadd.f32 %v2332_v7, %v2176_v8  ;;  %v2402_v47 = vpop.f32.mrb[17].mxu1 }
 0xa80   :  { %v2180_v11 = vmax.f32 %v2177_v9, 0.0 }
 0xa82   :  { %2274 = vst [vmem:[#allocation14] sm:$0xff] %v2180_v11  ;;  %2436 = vmatmul.mubr.f32.vlgmr.msra.gmra.mrb[32].mxu0 %v2180_v11 }
 0xa83   :  { %3462 = shalt.err (!%p3459_p10)
}
 0xa84   :  { %s3463_s6 = scalar_lea.hbm %s4213_s10, 128 }
 0xa85   :  { %p3464_p11 = scmp.ne.s32.totalorder %s4213_s10, %s3463_s6  ;;  %p3467_p12 = scmp.lt.u32.totalorder %s3463_s6, %s4213_s10 }
 0xa87   :  { %p3469_p13 = pnand %p3467_p12, %p3464_p11 }
 0xa89   :  { %3472 = shalt.err (!%p3469_p13)
}
 0xa8a   :  { %2295 = dma.vmem_to_hbm [thread:$0]  %s2293_s27, 128, %s4213_s10, [#allocation15]   ;;  %v2333_v13 = vld [vmem:[%s4211_s8] ss:$0 sm:$0xff] }
 0xa8b   :  { %s3523_s20 = smov [#allocation13]  }
 0xa8c   :  { %s2282_s21 = sshll.u32 %s3523_s20, 4  ;;  %s2283_s21 = int_to_ptr.vmem [resolvable:$true] %s2282_s21 }
 0xa8d   :  { %s3473_s22 = scalar_lea.vmem %s2283_s21, 128  ;;  %p3478_p1 = scmp.lt.s32.totalorder %s2283_s21, %s2283_s21 }
 0xa8e   :  { %p3474_p0 = scmp.ne.s32.totalorder %s2283_s21, %s3473_s22  ;;  %p3479_p2 = scmp.lt.s32.totalorder %s3473_s22, %s3473_s22 }
 0xa90   :  { %p3480_p3 = por %p3479_p2, %p3478_p1 }
 0xa92   :  { %p3481_p4 = pnand %p3480_p3, %p3474_p0 }
 0xb55   :  { %v2270_v16 = vpop.f32.mrb[32].mxu0 }
 0xb56   :  { %v2271_v29 = vadd.f32 %v2333_v13, %v2270_v16  ;;  %v2437_v17 = vpop.f32.mrb[33].mxu0 }
 0xb58   :  { %2275 = vst [vmem:[#allocation13] sm:$0xff] %v2271_v29 }
 0xb59   :  { %3484 = shalt.err (!%p3481_p4)
}
 0xb5a   :  { %s3485_s24 = scalar_lea.hbm %s4212_s9, 128 }
 0xb5b   :  { %p3486_p5 = scmp.ne.s32.totalorder %s4212_s9, %s3485_s24  ;;  %p3489_p6 = scmp.lt.u32.totalorder %s3485_s24, %s4212_s9 }
 0xb5d   :  { %p3491_p7 = pnand %p3489_p6, %p3486_p5 }
 0xb5f   :  { %3494 = shalt.err (!%p3491_p7)
}
 0xb60   :  { %2285 = dma.vmem_to_hbm [thread:$0]  %s2283_s21, 128, %s4212_s9, [#allocation4]  }
 0xb61   :  { %3503 = dma.done.wait [#allocation4], 128  }
 0xb62   :  { %3504 = vsyncadd [#allocation4], 4294967168 }
 0xb63   :  { %3505 = dma.done.wait [#allocation15], 128  }
 0xb64   :  { %3506 = vsyncadd [#allocation15], 4294967168 }
 0xb65   :  { %2302 = vsyncpa [#allocation3], 1 }
 0xb66   :  { %2303 = vsyncpa [#allocation6], 1 }
 0xb67   :  { %2304 = vsyncpa [#allocation9], 1 }
 0xb68   :  { %2305 = vsyncpa [#allocation12], 1 }
 0xb69   :  { %2306 = vsyncpa [#allocation4], 1 }
 0xb6a   :  { %2307 = vsyncpa [#allocation15], 1 }

</bundles_post_ra>
